<compile_context>
chip_gen: v7x
topology: tpu7x:2x2x1
jax: 0.10.0
libtpu: 0.0.40
codegen_flags: <defaults>
</compile_context>

<pallas_src>
import functools

import jax
import jax.numpy as jnp
from jax.experimental import pallas as pl
from jax.experimental.pallas import tpu as pltpu


def _round_up(x, m):
    return ((x + m - 1) // m) * m


def lstm_kernel(ids_ref, emb_ref, wih_ref, whh_ref, b_ref, wfc_ref, bfc_ref,
                out_ref, xall_ref, *, Bp, T, Hp, V, mxu_dtype):
    f32 = jnp.float32

    # ---- fused embedding lookup + input projection (hoisted out of the
    # recurrence): project the whole vocab once, with gate bias folded in.
    proj = (jnp.dot(emb_ref[...], wih_ref[...], preferred_element_type=f32)
            + b_ref[...])                                      # (V, 4*Hp)

    # ---- one-hot MXU gather: one matmul replaces B*T serial scalar copies.
    ids = ids_ref[...]                                         # (T*Bp, 1) int32
    iota = jax.lax.broadcasted_iota(jnp.int32, (T * Bp, V), 1)
    onehot = (ids == iota).astype(f32)                         # exact 0/1 select
    xall_ref[...] = jnp.dot(onehot, proj, preferred_element_type=f32)

    # ---- recurrence: T is small & static -> unrolled; h/c live in vregs
    # (1 vreg each).  W_hh is read from VMEM inside each step's dot (not
    # hoisted into a giant live value).
    # TODO(synk): for production-size T switch to lax.fori_loop carrying (h,c)
    # and slice x_t with pl.ds(pl.multiple_of(t * Bp, Bp), Bp).
    h = jnp.zeros((Bp, Hp), f32)
    c = jnp.zeros((Bp, Hp), f32)
    for t in range(T):
        x_t = xall_ref[pl.ds(t * Bp, Bp), :]                   # static (Bp, 4*Hp)
        gates = x_t + jnp.dot(h.astype(mxu_dtype), whh_ref[...],
                              preferred_element_type=f32)
        # Gate slabs are [i, f, o, g]: one sigmoid over a contiguous 3*Hp slab,
        # one tanh over the last slab (no wasted sigmoid on the g quarter).
        sg = jax.nn.sigmoid(gates[:, :3 * Hp])
        i_g = sg[:, 0 * Hp:1 * Hp]                             # 128-lane aligned
        f_g = sg[:, 1 * Hp:2 * Hp]
        o_g = sg[:, 2 * Hp:3 * Hp]
        g_g = jnp.tanh(gates[:, 3 * Hp:4 * Hp])
        c = f_g * c + i_g * g_g
        h = o_g * jnp.tanh(c)

    # ---- final Linear(H -> 1) + sigmoid: VPU multiply + lane reduction
    # (no N=1 MXU matmul); fc bias read from SMEM.
    logits = jnp.sum(h * wfc_ref[...], axis=-1, keepdims=True) + bfc_ref[0]
    out_ref[...] = jax.nn.sigmoid(logits)


def lstm_model_forward(x_ids, params, *, mxu_dtype=jnp.float32):
    """x_ids: (B, T) int32 token ids -> (B, 1) sigmoid scores."""
    emb = params["embedding"].astype(jnp.float32)   # (V, E)
    w_ih = params["w_ih"].astype(jnp.float32)       # (4H, E), PyTorch [i,f,g,o]
    w_hh = params["w_hh"].astype(jnp.float32)       # (4H, H)
    b_ih = params["b_ih"].astype(jnp.float32)       # (4H,)
    b_hh = params["b_hh"].astype(jnp.float32)       # (4H,)
    w_fc = params["fc_w"].astype(jnp.float32)       # (1, H)
    b_fc = params["fc_b"].astype(jnp.float32)       # (1,)

    B, T = x_ids.shape
    V, E = emb.shape
    H = w_hh.shape[1]
    Hp = _round_up(H, 128)                          # per-gate lane-aligned width
    G4 = 4 * Hp
    Bp = _round_up(B, 8)                            # sublane-aligned batch

    # PyTorch gate order [i, f, g, o] -> kernel slab order [i, f, o, g].
    perm = jnp.array([0, 1, 3, 2], dtype=jnp.int32)

    # ---- pad each gate onto its own Hp-lane slab (columns [k*Hp, k*Hp+H)).
    wih4 = jnp.zeros((4, E, Hp), jnp.float32).at[:, :, :H].set(
        jnp.transpose(w_ih.reshape(4, H, E)[perm], (0, 2, 1)))
    wih_pad = jnp.transpose(wih4, (1, 0, 2)).reshape(E, G4).astype(mxu_dtype)

    whh4 = jnp.zeros((4, Hp, Hp), jnp.float32).at[:, :H, :H].set(
        jnp.transpose(w_hh.reshape(4, H, H)[perm], (0, 2, 1)))
    whh_pad = jnp.transpose(whh4, (1, 0, 2)).reshape(Hp, G4).astype(mxu_dtype)

    bias_pad = jnp.zeros((4, Hp), jnp.float32).at[:, :H].set(
        (b_ih + b_hh).reshape(4, H)[perm]).reshape(1, G4)      # (1, 4*Hp) f32

    wfc_pad = jnp.zeros((1, Hp), jnp.float32).at[:, :H].set(w_fc)

    # Token ids, batch-padded and laid out time-major: row n = t*Bp + b.
    ids_pad = jnp.zeros((Bp, T), jnp.int32).at[:B, :].set(x_ids.astype(jnp.int32))
    ids_tm = ids_pad.T.reshape(T * Bp, 1)

    emb_in = emb.astype(mxu_dtype)

    kernel = functools.partial(lstm_kernel, Bp=Bp, T=T, Hp=Hp, V=V,
                               mxu_dtype=mxu_dtype)

    out = pl.pallas_call(
        kernel,
        out_shape=jax.ShapeDtypeStruct((Bp, 1), jnp.float32),
        grid_spec=pltpu.PrefetchScalarGridSpec(
            num_scalar_prefetch=0,
            grid=(1,),
            in_specs=[
                pl.BlockSpec((T * Bp, 1), lambda i: (0, 0)),    # token ids (VMEM)
                pl.BlockSpec((V, E), lambda i: (0, 0)),         # embedding table
                pl.BlockSpec((E, G4), lambda i: (0, 0)),        # W_ih^T (padded)
                pl.BlockSpec((Hp, G4), lambda i: (0, 0)),       # W_hh^T (padded)
                pl.BlockSpec((1, G4), lambda i: (0, 0)),        # gate bias (padded)
                pl.BlockSpec((1, Hp), lambda i: (0, 0)),        # fc weight row
                pl.BlockSpec(memory_space=pltpu.MemorySpace.SMEM),  # fc bias scalar
            ],
            out_specs=pl.BlockSpec((Bp, 1), lambda i: (0, 0)),
            scratch_shapes=[
                pltpu.VMEM((T * Bp, G4), jnp.float32),          # gathered gate inputs
            ],
        ),
        compiler_params=pltpu.CompilerParams(
            dimension_semantics=("arbitrary",),
            vmem_limit_bytes=32 * 1024 * 1024),
    )(ids_tm, emb_in, wih_pad, whh_pad, bias_pad, wfc_pad, b_fc)
    return out[:B]


def lstm_reference(x_ids, params):
    """Pure-JAX reference matching the PyTorch module."""
    emb = params["embedding"]
    w_ih, w_hh = params["w_ih"], params["w_hh"]
    b = params["b_ih"] + params["b_hh"]
    H = w_hh.shape[1]
    x = emb[x_ids].astype(jnp.float32)              # (B, T, E)
    B, T, _ = x.shape
    h = jnp.zeros((B, H), jnp.float32)
    c = jnp.zeros((B, H), jnp.float32)
    for t in range(T):
        g = x[:, t] @ w_ih.T + h @ w_hh.T + b
        i = jax.nn.sigmoid(g[:, 0 * H:1 * H])
        f = jax.nn.sigmoid(g[:, 1 * H:2 * H])
        gg = jnp.tanh(g[:, 2 * H:3 * H])
        o = jax.nn.sigmoid(g[:, 3 * H:4 * H])
        c = f * c + i * gg
        h = o * jnp.tanh(c)
    return jax.nn.sigmoid(h @ params["fc_w"].T + params["fc_b"])


def init_params(key, input_dim, embedding_dim, hidden_dim):
    ks = jax.random.split(key, 7)
    scale = 0.1
    return {
        "embedding": scale * jax.random.normal(ks[0], (input_dim, embedding_dim), jnp.float32),
        "w_ih": scale * jax.random.normal(ks[1], (4 * hidden_dim, embedding_dim), jnp.float32),
        "w_hh": scale * jax.random.normal(ks[2], (4 * hidden_dim, hidden_dim), jnp.float32),
        "b_ih": scale * jax.random.normal(ks[3], (4 * hidden_dim,), jnp.float32),
        "b_hh": scale * jax.random.normal(ks[4], (4 * hidden_dim,), jnp.float32),
        "fc_w": scale * jax.random.normal(ks[5], (1, hidden_dim), jnp.float32),
        "fc_b": scale * jax.random.normal(ks[6], (1,), jnp.float32),
    }


if __name__ == "__main__":
    key = jax.random.PRNGKey(0)
    k_param, k_ids = jax.random.split(key)

    input_dim = 16       # vocab size
    embedding_dim = 32
    hidden_dim = 32
    B, T = 2, 8

    params = init_params(k_param, input_dim, embedding_dim, hidden_dim)
    x_ids = jax.random.randint(k_ids, (B, T), 0, input_dim, dtype=jnp.int32)

    ref = lstm_reference(x_ids, params)

    # f32 MXU operands: bit-faithful to the PyTorch module (tight tolerance).
    out = lstm_model_forward(x_ids, params, mxu_dtype=jnp.float32)
    jax.block_until_ready(out)
    assert out.shape == (B, 1)
    assert jnp.allclose(out, ref, atol=1e-4, rtol=1e-4), (out, ref)

    # bf16 MXU operands (v6e/v7x fast path); elementwise math stays f32.
    out_bf16 = lstm_model_forward(x_ids, params, mxu_dtype=jnp.bfloat16)
    jax.block_until_ready(out_bf16)
    assert out_bf16.shape == (B, 1)
    assert jnp.allclose(out_bf16, ref, atol=5e-3, rtol=5e-3), (out_bf16, ref)

    print("KERNEL_OK")
</pallas_src>

<mosaic_0001>
module attributes {stable_mosaic.version = 11 : i64} {
  func.func @lstm_kernel(%arg0: i32, %arg1: memref<64x1xi32, #tpu.memory_space<vmem>>, %arg2: memref<16x32xf32, #tpu.memory_space<vmem>>, %arg3: memref<32x512xf32, #tpu.memory_space<vmem>>, %arg4: memref<128x512xf32, #tpu.memory_space<vmem>>, %arg5: memref<1x512xf32, #tpu.memory_space<vmem>>, %arg6: memref<1x128xf32, #tpu.memory_space<vmem>>, %arg7: memref<1xf32, #tpu.memory_space<smem>>, %arg8: memref<8x1xf32, #tpu.memory_space<vmem>>, %arg9: memref<64x512xf32, #tpu.memory_space<vmem>>) attributes {dimension_semantics = [#tpu.dimension_semantics<arbitrary>], iteration_bounds = array<i64: 1>, scalar_prefetch = 0 : i64, scratch_operands = 1 : i64, tpu.core_type = #tpu.core_type<tc>, window_params = [{pipeline_mode = #tpu.pipeline_mode<synchronous>, transform_indices = @transform_0, window_bounds = array<i64: 64, 1>}, {pipeline_mode = #tpu.pipeline_mode<synchronous>, transform_indices = @transform_1, window_bounds = array<i64: 16, 32>}, {pipeline_mode = #tpu.pipeline_mode<synchronous>, transform_indices = @transform_2, window_bounds = array<i64: 32, 512>}, {pipeline_mode = #tpu.pipeline_mode<synchronous>, transform_indices = @transform_3, window_bounds = array<i64: 128, 512>}, {pipeline_mode = #tpu.pipeline_mode<synchronous>, transform_indices = @transform_4, window_bounds = array<i64: 1, 512>}, {pipeline_mode = #tpu.pipeline_mode<synchronous>, transform_indices = @transform_5, window_bounds = array<i64: 1, 128>}, {transform_indices = @transform_6, window_bounds = array<i64: 1>}, {pipeline_mode = #tpu.pipeline_mode<synchronous>, transform_indices = @transform_7, window_bounds = array<i64: 8, 1>}]} {
    %c0 = arith.constant 0 : index
    %c0_0 = arith.constant 0 : index
    %0 = vector.load %arg2[%c0, %c0_0] : memref<16x32xf32, #tpu.memory_space<vmem>>, vector<16x32xf32>
    %c0_1 = arith.constant 0 : index
    %c0_2 = arith.constant 0 : index
    %1 = vector.load %arg3[%c0_1, %c0_2] : memref<32x512xf32, #tpu.memory_space<vmem>>, vector<32x512xf32>
    %cst = arith.constant dense<0.000000e+00> : vector<16x512xf32>
    %2 = tpu.matmul %0, %1, %cst {dimension_numbers = #tpu.dot_dimension_numbers<[1], [0], [0], [1], [0, 0, 1, 1], [], []>} : vector<16x32xf32>, vector<32x512xf32>, vector<16x512xf32> -> vector<16x512xf32>
    %c0_3 = arith.constant 0 : index
    %c0_4 = arith.constant 0 : index
    %3 = vector.load %arg5[%c0_3, %c0_4] : memref<1x512xf32, #tpu.memory_space<vmem>>, vector<1x512xf32>
    %4 = vector.broadcast %3 : vector<1x512xf32> to vector<16x512xf32>
    %5 = arith.addf %2, %4 : vector<16x512xf32>
    %c0_5 = arith.constant 0 : index
    %c0_6 = arith.constant 0 : index
    %6 = vector.load %arg1[%c0_5, %c0_6] : memref<64x1xi32, #tpu.memory_space<vmem>>, vector<64x1xi32>
    %7 = tpu.iota {dimensions = array<i32: 1>} : vector<64x16xi32>
    %8 = vector.broadcast %6 : vector<64x1xi32> to vector<64x16xi32>
    %9 = arith.cmpi eq, %8, %7 : vector<64x16xi32>
    %10 = arith.extui %9 : vector<64x16xi1> to vector<64x16xi32>
    %11 = arith.sitofp %10 : vector<64x16xi32> to vector<64x16xf32>
    %cst_7 = arith.constant dense<0.000000e+00> : vector<64x512xf32>
    %12 = tpu.matmul %11, %5, %cst_7 {dimension_numbers = #tpu.dot_dimension_numbers<[1], [0], [0], [1], [0, 0, 1, 1], [], []>} : vector<64x16xf32>, vector<16x512xf32>, vector<64x512xf32> -> vector<64x512xf32>
    %c0_8 = arith.constant 0 : index
    %c0_9 = arith.constant 0 : index
    %13 = vector.load %arg9[%c0_8, %c0_9] : memref<64x512xf32, #tpu.memory_space<vmem>>, vector<64x512xf32>
    tpu.vector_store %arg9[%c0_8, %c0_9], %12 {strides = array<i32>} : memref<64x512xf32, #tpu.memory_space<vmem>>, vector<64x512xf32>,
    %cst_10 = arith.constant 0.000000e+00 : f32
    %14 = vector.broadcast %cst_10 : f32 to vector<8x128xf32>
    %cst_11 = arith.constant 0.000000e+00 : f32
    %15 = vector.broadcast %cst_11 : f32 to vector<8x128xf32>
    %c0_12 = arith.constant 0 : index
    %c0_13 = arith.constant 0 : index
    %16 = vector.load %arg9[%c0_12, %c0_13] : memref<64x512xf32, #tpu.memory_space<vmem>>, vector<8x512xf32>
    %c0_14 = arith.constant 0 : index
    %c0_15 = arith.constant 0 : index
    %17 = vector.load %arg4[%c0_14, %c0_15] : memref<128x512xf32, #tpu.memory_space<vmem>>, vector<128x512xf32>
    %cst_16 = arith.constant dense<0.000000e+00> : vector<8x512xf32>
    %18 = tpu.matmul %14, %17, %cst_16 {dimension_numbers = #tpu.dot_dimension_numbers<[1], [0], [0], [1], [0, 0, 1, 1], [], []>} : vector<8x128xf32>, vector<128x512xf32>, vector<8x512xf32> -> vector<8x512xf32>
    %19 = arith.addf %16, %18 : vector<8x512xf32>
    %20 = vector.extract_strided_slice %19 {offsets = [0, 0], sizes = [8, 384], strides = [1, 1]} : vector<8x512xf32> to vector<8x384xf32>
    %21 = arith.negf %20 : vector<8x384xf32>
    %22 = math.exp %21 : vector<8x384xf32>
    %cst_17 = arith.constant 1.000000e+00 : f32
    %23 = vector.broadcast %cst_17 : f32 to vector<8x384xf32>
    %24 = arith.addf %23, %22 : vector<8x384xf32>
    %25 = arith.divf %23, %24 : vector<8x384xf32>
    %26 = vector.extract_strided_slice %25 {offsets = [0, 0], sizes = [8, 128], strides = [1, 1]} : vector<8x384xf32> to vector<8x128xf32>
    %27 = vector.extract_strided_slice %25 {offsets = [0, 128], sizes = [8, 128], strides = [1, 1]} : vector<8x384xf32> to vector<8x128xf32>
    %28 = vector.extract_strided_slice %25 {offsets = [0, 256], sizes = [8, 128], strides = [1, 1]} : vector<8x384xf32> to vector<8x128xf32>
    %29 = vector.extract_strided_slice %19 {offsets = [0, 384], sizes = [8, 128], strides = [1, 1]} : vector<8x512xf32> to vector<8x128xf32>
    %30 = math.tanh %29 : vector<8x128xf32>
    %31 = arith.mulf %27, %15 : vector<8x128xf32>
    %32 = arith.mulf %26, %30 : vector<8x128xf32>
    %33 = arith.addf %31, %32 : vector<8x128xf32>
    %34 = math.tanh %33 : vector<8x128xf32>
    %35 = arith.mulf %28, %34 : vector<8x128xf32>
    %c8 = arith.constant 8 : index
    %c0_18 = arith.constant 0 : index
    %36 = vector.load %arg9[%c8, %c0_18] : memref<64x512xf32, #tpu.memory_space<vmem>>, vector<8x512xf32>
    %c0_19 = arith.constant 0 : index
    %c0_20 = arith.constant 0 : index
    %37 = vector.load %arg4[%c0_19, %c0_20] : memref<128x512xf32, #tpu.memory_space<vmem>>, vector<128x512xf32>
    %cst_21 = arith.constant dense<0.000000e+00> : vector<8x512xf32>
    %38 = tpu.matmul %35, %37, %cst_21 {dimension_numbers = #tpu.dot_dimension_numbers<[1], [0], [0], [1], [0, 0, 1, 1], [], []>} : vector<8x128xf32>, vector<128x512xf32>, vector<8x512xf32> -> vector<8x512xf32>
    %39 = arith.addf %36, %38 : vector<8x512xf32>
    %40 = vector.extract_strided_slice %39 {offsets = [0, 0], sizes = [8, 384], strides = [1, 1]} : vector<8x512xf32> to vector<8x384xf32>
    %41 = arith.negf %40 : vector<8x384xf32>
    %42 = math.exp %41 : vector<8x384xf32>
    %cst_22 = arith.constant 1.000000e+00 : f32
    %43 = vector.broadcast %cst_22 : f32 to vector<8x384xf32>
    %44 = arith.addf %43, %42 : vector<8x384xf32>
    %45 = arith.divf %43, %44 : vector<8x384xf32>
    %46 = vector.extract_strided_slice %45 {offsets = [0, 0], sizes = [8, 128], strides = [1, 1]} : vector<8x384xf32> to vector<8x128xf32>
    %47 = vector.extract_strided_slice %45 {offsets = [0, 128], sizes = [8, 128], strides = [1, 1]} : vector<8x384xf32> to vector<8x128xf32>
    %48 = vector.extract_strided_slice %45 {offsets = [0, 256], sizes = [8, 128], strides = [1, 1]} : vector<8x384xf32> to vector<8x128xf32>
    %49 = vector.extract_strided_slice %39 {offsets = [0, 384], sizes = [8, 128], strides = [1, 1]} : vector<8x512xf32> to vector<8x128xf32>
    %50 = math.tanh %49 : vector<8x128xf32>
    %51 = arith.mulf %47, %33 : vector<8x128xf32>
    %52 = arith.mulf %46, %50 : vector<8x128xf32>
    %53 = arith.addf %51, %52 : vector<8x128xf32>
    %54 = math.tanh %53 : vector<8x128xf32>
    %55 = arith.mulf %48, %54 : vector<8x128xf32>
    %c16 = arith.constant 16 : index
    %c0_23 = arith.constant 0 : index
    %56 = vector.load %arg9[%c16, %c0_23] : memref<64x512xf32, #tpu.memory_space<vmem>>, vector<8x512xf32>
    %c0_24 = arith.constant 0 : index
    %c0_25 = arith.constant 0 : index
    %57 = vector.load %arg4[%c0_24, %c0_25] : memref<128x512xf32, #tpu.memory_space<vmem>>, vector<128x512xf32>
    %cst_26 = arith.constant dense<0.000000e+00> : vector<8x512xf32>
    %58 = tpu.matmul %55, %57, %cst_26 {dimension_numbers = #tpu.dot_dimension_numbers<[1], [0], [0], [1], [0, 0, 1, 1], [], []>} : vector<8x128xf32>, vector<128x512xf32>, vector<8x512xf32> -> vector<8x512xf32>
    %59 = arith.addf %56, %58 : vector<8x512xf32>
    %60 = vector.extract_strided_slice %59 {offsets = [0, 0], sizes = [8, 384], strides = [1, 1]} : vector<8x512xf32> to vector<8x384xf32>
    %61 = arith.negf %60 : vector<8x384xf32>
    %62 = math.exp %61 : vector<8x384xf32>
    %cst_27 = arith.constant 1.000000e+00 : f32
    %63 = vector.broadcast %cst_27 : f32 to vector<8x384xf32>
    %64 = arith.addf %63, %62 : vector<8x384xf32>
    %65 = arith.divf %63, %64 : vector<8x384xf32>
    %66 = vector.extract_strided_slice %65 {offsets = [0, 0], sizes = [8, 128], strides = [1, 1]} : vector<8x384xf32> to vector<8x128xf32>
    %67 = vector.extract_strided_slice %65 {offsets = [0, 128], sizes = [8, 128], strides = [1, 1]} : vector<8x384xf32> to vector<8x128xf32>
    %68 = vector.extract_strided_slice %65 {offsets = [0, 256], sizes = [8, 128], strides = [1, 1]} : vector<8x384xf32> to vector<8x128xf32>
    %69 = vector.extract_strided_slice %59 {offsets = [0, 384], sizes = [8, 128], strides = [1, 1]} : vector<8x512xf32> to vector<8x128xf32>
    %70 = math.tanh %69 : vector<8x128xf32>
    %71 = arith.mulf %67, %53 : vector<8x128xf32>
    %72 = arith.mulf %66, %70 : vector<8x128xf32>
    %73 = arith.addf %71, %72 : vector<8x128xf32>
    %74 = math.tanh %73 : vector<8x128xf32>
    %75 = arith.mulf %68, %74 : vector<8x128xf32>
    %c24 = arith.constant 24 : index
    %c0_28 = arith.constant 0 : index
    %76 = vector.load %arg9[%c24, %c0_28] : memref<64x512xf32, #tpu.memory_space<vmem>>, vector<8x512xf32>
    %c0_29 = arith.constant 0 : index
    %c0_30 = arith.constant 0 : index
    %77 = vector.load %arg4[%c0_29, %c0_30] : memref<128x512xf32, #tpu.memory_space<vmem>>, vector<128x512xf32>
    %cst_31 = arith.constant dense<0.000000e+00> : vector<8x512xf32>
    %78 = tpu.matmul %75, %77, %cst_31 {dimension_numbers = #tpu.dot_dimension_numbers<[1], [0], [0], [1], [0, 0, 1, 1], [], []>} : vector<8x128xf32>, vector<128x512xf32>, vector<8x512xf32> -> vector<8x512xf32>
    %79 = arith.addf %76, %78 : vector<8x512xf32>
    %80 = vector.extract_strided_slice %79 {offsets = [0, 0], sizes = [8, 384], strides = [1, 1]} : vector<8x512xf32> to vector<8x384xf32>
    %81 = arith.negf %80 : vector<8x384xf32>
    %82 = math.exp %81 : vector<8x384xf32>
    %cst_32 = arith.constant 1.000000e+00 : f32
    %83 = vector.broadcast %cst_32 : f32 to vector<8x384xf32>
    %84 = arith.addf %83, %82 : vector<8x384xf32>
    %85 = arith.divf %83, %84 : vector<8x384xf32>
    %86 = vector.extract_strided_slice %85 {offsets = [0, 0], sizes = [8, 128], strides = [1, 1]} : vector<8x384xf32> to vector<8x128xf32>
    %87 = vector.extract_strided_slice %85 {offsets = [0, 128], sizes = [8, 128], strides = [1, 1]} : vector<8x384xf32> to vector<8x128xf32>
    %88 = vector.extract_strided_slice %85 {offsets = [0, 256], sizes = [8, 128], strides = [1, 1]} : vector<8x384xf32> to vector<8x128xf32>
    %89 = vector.extract_strided_slice %79 {offsets = [0, 384], sizes = [8, 128], strides = [1, 1]} : vector<8x512xf32> to vector<8x128xf32>
    %90 = math.tanh %89 : vector<8x128xf32>
    %91 = arith.mulf %87, %73 : vector<8x128xf32>
    %92 = arith.mulf %86, %90 : vector<8x128xf32>
    %93 = arith.addf %91, %92 : vector<8x128xf32>
    %94 = math.tanh %93 : vector<8x128xf32>
    %95 = arith.mulf %88, %94 : vector<8x128xf32>
    %c32 = arith.constant 32 : index
    %c0_33 = arith.constant 0 : index
    %96 = vector.load %arg9[%c32, %c0_33] : memref<64x512xf32, #tpu.memory_space<vmem>>, vector<8x512xf32>
    %c0_34 = arith.constant 0 : index
    %c0_35 = arith.constant 0 : index
    %97 = vector.load %arg4[%c0_34, %c0_35] : memref<128x512xf32, #tpu.memory_space<vmem>>, vector<128x512xf32>
    %cst_36 = arith.constant dense<0.000000e+00> : vector<8x512xf32>
    %98 = tpu.matmul %95, %97, %cst_36 {dimension_numbers = #tpu.dot_dimension_numbers<[1], [0], [0], [1], [0, 0, 1, 1], [], []>} : vector<8x128xf32>, vector<128x512xf32>, vector<8x512xf32> -> vector<8x512xf32>
    %99 = arith.addf %96, %98 : vector<8x512xf32>
    %100 = vector.extract_strided_slice %99 {offsets = [0, 0], sizes = [8, 384], strides = [1, 1]} : vector<8x512xf32> to vector<8x384xf32>
    %101 = arith.negf %100 : vector<8x384xf32>
    %102 = math.exp %101 : vector<8x384xf32>
    %cst_37 = arith.constant 1.000000e+00 : f32
    %103 = vector.broadcast %cst_37 : f32 to vector<8x384xf32>
    %104 = arith.addf %103, %102 : vector<8x384xf32>
    %105 = arith.divf %103, %104 : vector<8x384xf32>
    %106 = vector.extract_strided_slice %105 {offsets = [0, 0], sizes = [8, 128], strides = [1, 1]} : vector<8x384xf32> to vector<8x128xf32>
    %107 = vector.extract_strided_slice %105 {offsets = [0, 128], sizes = [8, 128], strides = [1, 1]} : vector<8x384xf32> to vector<8x128xf32>
    %108 = vector.extract_strided_slice %105 {offsets = [0, 256], sizes = [8, 128], strides = [1, 1]} : vector<8x384xf32> to vector<8x128xf32>
    %109 = vector.extract_strided_slice %99 {offsets = [0, 384], sizes = [8, 128], strides = [1, 1]} : vector<8x512xf32> to vector<8x128xf32>
    %110 = math.tanh %109 : vector<8x128xf32>
    %111 = arith.mulf %107, %93 : vector<8x128xf32>
    %112 = arith.mulf %106, %110 : vector<8x128xf32>
    %113 = arith.addf %111, %112 : vector<8x128xf32>
    %114 = math.tanh %113 : vector<8x128xf32>
    %115 = arith.mulf %108, %114 : vector<8x128xf32>
    %c40 = arith.constant 40 : index
    %c0_38 = arith.constant 0 : index
    %116 = vector.load %arg9[%c40, %c0_38] : memref<64x512xf32, #tpu.memory_space<vmem>>, vector<8x512xf32>
    %c0_39 = arith.constant 0 : index
    %c0_40 = arith.constant 0 : index
    %117 = vector.load %arg4[%c0_39, %c0_40] : memref<128x512xf32, #tpu.memory_space<vmem>>, vector<128x512xf32>
    %cst_41 = arith.constant dense<0.000000e+00> : vector<8x512xf32>
    %118 = tpu.matmul %115, %117, %cst_41 {dimension_numbers = #tpu.dot_dimension_numbers<[1], [0], [0], [1], [0, 0, 1, 1], [], []>} : vector<8x128xf32>, vector<128x512xf32>, vector<8x512xf32> -> vector<8x512xf32>
    %119 = arith.addf %116, %118 : vector<8x512xf32>
    %120 = vector.extract_strided_slice %119 {offsets = [0, 0], sizes = [8, 384], strides = [1, 1]} : vector<8x512xf32> to vector<8x384xf32>
    %121 = arith.negf %120 : vector<8x384xf32>
    %122 = math.exp %121 : vector<8x384xf32>
    %cst_42 = arith.constant 1.000000e+00 : f32
    %123 = vector.broadcast %cst_42 : f32 to vector<8x384xf32>
    %124 = arith.addf %123, %122 : vector<8x384xf32>
    %125 = arith.divf %123, %124 : vector<8x384xf32>
    %126 = vector.extract_strided_slice %125 {offsets = [0, 0], sizes = [8, 128], strides = [1, 1]} : vector<8x384xf32> to vector<8x128xf32>
    %127 = vector.extract_strided_slice %125 {offsets = [0, 128], sizes = [8, 128], strides = [1, 1]} : vector<8x384xf32> to vector<8x128xf32>
    %128 = vector.extract_strided_slice %125 {offsets = [0, 256], sizes = [8, 128], strides = [1, 1]} : vector<8x384xf32> to vector<8x128xf32>
    %129 = vector.extract_strided_slice %119 {offsets = [0, 384], sizes = [8, 128], strides = [1, 1]} : vector<8x512xf32> to vector<8x128xf32>
    %130 = math.tanh %129 : vector<8x128xf32>
    %131 = arith.mulf %127, %113 : vector<8x128xf32>
    %132 = arith.mulf %126, %130 : vector<8x128xf32>
    %133 = arith.addf %131, %132 : vector<8x128xf32>
    %134 = math.tanh %133 : vector<8x128xf32>
    %135 = arith.mulf %128, %134 : vector<8x128xf32>
    %c48 = arith.constant 48 : index
    %c0_43 = arith.constant 0 : index
    %136 = vector.load %arg9[%c48, %c0_43] : memref<64x512xf32, #tpu.memory_space<vmem>>, vector<8x512xf32>
    %c0_44 = arith.constant 0 : index
    %c0_45 = arith.constant 0 : index
    %137 = vector.load %arg4[%c0_44, %c0_45] : memref<128x512xf32, #tpu.memory_space<vmem>>, vector<128x512xf32>
    %cst_46 = arith.constant dense<0.000000e+00> : vector<8x512xf32>
    %138 = tpu.matmul %135, %137, %cst_46 {dimension_numbers = #tpu.dot_dimension_numbers<[1], [0], [0], [1], [0, 0, 1, 1], [], []>} : vector<8x128xf32>, vector<128x512xf32>, vector<8x512xf32> -> vector<8x512xf32>
    %139 = arith.addf %136, %138 : vector<8x512xf32>
    %140 = vector.extract_strided_slice %139 {offsets = [0, 0], sizes = [8, 384], strides = [1, 1]} : vector<8x512xf32> to vector<8x384xf32>
    %141 = arith.negf %140 : vector<8x384xf32>
    %142 = math.exp %141 : vector<8x384xf32>
    %cst_47 = arith.constant 1.000000e+00 : f32
    %143 = vector.broadcast %cst_47 : f32 to vector<8x384xf32>
    %144 = arith.addf %143, %142 : vector<8x384xf32>
    %145 = arith.divf %143, %144 : vector<8x384xf32>
    %146 = vector.extract_strided_slice %145 {offsets = [0, 0], sizes = [8, 128], strides = [1, 1]} : vector<8x384xf32> to vector<8x128xf32>
    %147 = vector.extract_strided_slice %145 {offsets = [0, 128], sizes = [8, 128], strides = [1, 1]} : vector<8x384xf32> to vector<8x128xf32>
    %148 = vector.extract_strided_slice %145 {offsets = [0, 256], sizes = [8, 128], strides = [1, 1]} : vector<8x384xf32> to vector<8x128xf32>
    %149 = vector.extract_strided_slice %139 {offsets = [0, 384], sizes = [8, 128], strides = [1, 1]} : vector<8x512xf32> to vector<8x128xf32>
    %150 = math.tanh %149 : vector<8x128xf32>
    %151 = arith.mulf %147, %133 : vector<8x128xf32>
    %152 = arith.mulf %146, %150 : vector<8x128xf32>
    %153 = arith.addf %151, %152 : vector<8x128xf32>
    %154 = math.tanh %153 : vector<8x128xf32>
    %155 = arith.mulf %148, %154 : vector<8x128xf32>
    %c56 = arith.constant 56 : index
    %c0_48 = arith.constant 0 : index
    %156 = vector.load %arg9[%c56, %c0_48] : memref<64x512xf32, #tpu.memory_space<vmem>>, vector<8x512xf32>
    %c0_49 = arith.constant 0 : index
    %c0_50 = arith.constant 0 : index
    %157 = vector.load %arg4[%c0_49, %c0_50] : memref<128x512xf32, #tpu.memory_space<vmem>>, vector<128x512xf32>
    %cst_51 = arith.constant dense<0.000000e+00> : vector<8x512xf32>
    %158 = tpu.matmul %155, %157, %cst_51 {dimension_numbers = #tpu.dot_dimension_numbers<[1], [0], [0], [1], [0, 0, 1, 1], [], []>} : vector<8x128xf32>, vector<128x512xf32>, vector<8x512xf32> -> vector<8x512xf32>
    %159 = arith.addf %156, %158 : vector<8x512xf32>
    %160 = vector.extract_strided_slice %159 {offsets = [0, 0], sizes = [8, 384], strides = [1, 1]} : vector<8x512xf32> to vector<8x384xf32>
    %161 = arith.negf %160 : vector<8x384xf32>
    %162 = math.exp %161 : vector<8x384xf32>
    %cst_52 = arith.constant 1.000000e+00 : f32
    %163 = vector.broadcast %cst_52 : f32 to vector<8x384xf32>
    %164 = arith.addf %163, %162 : vector<8x384xf32>
    %165 = arith.divf %163, %164 : vector<8x384xf32>
    %166 = vector.extract_strided_slice %165 {offsets = [0, 0], sizes = [8, 128], strides = [1, 1]} : vector<8x384xf32> to vector<8x128xf32>
    %167 = vector.extract_strided_slice %165 {offsets = [0, 128], sizes = [8, 128], strides = [1, 1]} : vector<8x384xf32> to vector<8x128xf32>
    %168 = vector.extract_strided_slice %165 {offsets = [0, 256], sizes = [8, 128], strides = [1, 1]} : vector<8x384xf32> to vector<8x128xf32>
    %169 = vector.extract_strided_slice %159 {offsets = [0, 384], sizes = [8, 128], strides = [1, 1]} : vector<8x512xf32> to vector<8x128xf32>
    %170 = math.tanh %169 : vector<8x128xf32>
    %171 = arith.mulf %167, %153 : vector<8x128xf32>
    %172 = arith.mulf %166, %170 : vector<8x128xf32>
    %173 = arith.addf %171, %172 : vector<8x128xf32>
    %174 = math.tanh %173 : vector<8x128xf32>
    %175 = arith.mulf %168, %174 : vector<8x128xf32>
    %c0_53 = arith.constant 0 : index
    %c0_54 = arith.constant 0 : index
    %176 = vector.load %arg6[%c0_53, %c0_54] : memref<1x128xf32, #tpu.memory_space<vmem>>, vector<1x128xf32>
    %177 = vector.broadcast %176 : vector<1x128xf32> to vector<8x128xf32>
    %178 = arith.mulf %175, %177 : vector<8x128xf32>
    %cst_55 = arith.constant dense<0.000000e+00> : vector<8xf32>
    %179 = vector.multi_reduction <add>, %178, %cst_55 [1] : vector<8x128xf32> to vector<8xf32>
    %180 = vector.shape_cast %179 : vector<8xf32> to vector<8x1xf32>
    %c0_56 = arith.constant 0 : index
    %181 = memref.load %arg7[%c0_56] : memref<1xf32, #tpu.memory_space<smem>>
    %182 = vector.broadcast %181 : f32 to vector<8x1xf32>
    %183 = arith.addf %180, %182 : vector<8x1xf32>
    %184 = arith.negf %183 : vector<8x1xf32>
    %185 = math.exp %184 : vector<8x1xf32>
    %cst_57 = arith.constant 1.000000e+00 : f32
    %186 = vector.broadcast %cst_57 : f32 to vector<8x1xf32>
    %187 = arith.addf %186, %185 : vector<8x1xf32>
    %188 = arith.divf %186, %187 : vector<8x1xf32>
    %c0_58 = arith.constant 0 : index
    %c0_59 = arith.constant 0 : index
    %189 = vector.load %arg8[%c0_58, %c0_59] : memref<8x1xf32, #tpu.memory_space<vmem>>, vector<8x1xf32>
    tpu.vector_store %arg8[%c0_58, %c0_59], %188 {strides = array<i32>} : memref<8x1xf32, #tpu.memory_space<vmem>>, vector<8x1xf32>,
    return
  }
  func.func @transform_0(%arg0: i32) -> (i32, i32) {
    %c0_i32 = arith.constant 0 : i32
    %c0_i32_0 = arith.constant 0 : i32
    %c0_i32_1 = arith.constant 0 : i32
    return %c0_i32, %c0_i32_0 : i32, i32
  }
  func.func @transform_1(%arg0: i32) -> (i32, i32) {
    %c0_i32 = arith.constant 0 : i32
    %c0_i32_0 = arith.constant 0 : i32
    %c0_i32_1 = arith.constant 0 : i32
    return %c0_i32, %c0_i32_0 : i32, i32
  }
  func.func @transform_2(%arg0: i32) -> (i32, i32) {
    %c0_i32 = arith.constant 0 : i32
    %c0_i32_0 = arith.constant 0 : i32
    %c0_i32_1 = arith.constant 0 : i32
    return %c0_i32, %c0_i32_0 : i32, i32
  }
  func.func @transform_3(%arg0: i32) -> (i32, i32) {
    %c0_i32 = arith.constant 0 : i32
    %c0_i32_0 = arith.constant 0 : i32
    %c0_i32_1 = arith.constant 0 : i32
    return %c0_i32, %c0_i32_0 : i32, i32
  }
  func.func @transform_4(%arg0: i32) -> (i32, i32) {
    %c0_i32 = arith.constant 0 : i32
    %c0_i32_0 = arith.constant 0 : i32
    %c0_i32_1 = arith.constant 0 : i32
    return %c0_i32, %c0_i32_0 : i32, i32
  }
  func.func @transform_5(%arg0: i32) -> (i32, i32) {
    %c0_i32 = arith.constant 0 : i32
    %c0_i32_0 = arith.constant 0 : i32
    %c0_i32_1 = arith.constant 0 : i32
    return %c0_i32, %c0_i32_0 : i32, i32
  }
  func.func @transform_6(%arg0: i32) -> i32 {
    %c0_i32 = arith.constant 0 : i32
    %c0_i32_0 = arith.constant 0 : i32
    return %c0_i32 : i32
  }
  func.func @transform_7(%arg0: i32) -> (i32, i32) {
    %c0_i32 = arith.constant 0 : i32
    %c0_i32_0 = arith.constant 0 : i32
    %c0_i32_1 = arith.constant 0 : i32
    return %c0_i32, %c0_i32_0 : i32, i32
  }
}

</mosaic_0001>

<bundles_post_ra>
// kernel: tpu_custom_call.1
= control target key start
LH: loop header
LB: loop body
LE: loop exit
PB: predicated region body
PF: predicated region fallthrough
CT: control target
= control target key end

     0   :  { %13 = vsyncpa [#allocation5], 0  ;;  %s3430_s0 = inlined_call_operand.vmem [shape: s32[64,1], index: 0, kind: input, shape index: {}]   ;;  %s3431_s1 = inlined_call_operand.vmem [shape: f32[16,32], index: 1, kind: input, shape index: {}]   ;;  %s3432_s2 = inlined_call_operand.hbm [shape: f32[32,512], index: 2, kind: input, shape index: {}]   ;;  %s3433_s3 = inlined_call_operand.hbm [shape: f32[128,512], index: 3, kind: input, shape index: {}]   ;;  %s3434_s4 = inlined_call_operand.vmem [shape: f32[1,512], index: 4, kind: input, shape index: {}]   ;;  %s3435_s5 = inlined_call_operand.vmem [shape: f32[1,128], index: 5, kind: input, shape index: {}]   ;;  %s3436_s6 = inlined_call_operand.<no memory space> [shape: f32[1], index: 6, kind: input, shape index: {}]   ;;  %s3437_s7 = inlined_call_operand.vmem [shape: f32[8,1], index: 7, kind: output, shape index: {}]  }
   0x1   :  { %14 = vsyncpa [#allocation7], 0  ;;  %s2890_s24 = smov [#allocation4]   ;;  %s2842_s28 = scalar_lea.hbm %s3432_s2, 2048 }
   0x2   :  { %s24_s25 = sshll.u32 %s2890_s24, 4  ;;  %p2843_p0 = scmp.ne.s32.totalorder %s3432_s2, %s2842_s28  ;;  %s25_s25 = int_to_ptr.vmem [resolvable:$true] %s24_s25 }
   0x3   :  { %p2846_p1 = scmp.lt.u32.totalorder %s2842_s28, %s3432_s2 }
   0x5   :  { %p2848_p2 = pnand %p2846_p1, %p2843_p0 }
   0x7   :  { %2851 = shalt.err (!%p2848_p2)
}
   0x8   :  { %s2852_s10 = scalar_lea.vmem %s25_s25, 2048  ;;  %p2857_p4 = scmp.lt.s32.totalorder %s25_s25, %s25_s25 }
   0x9   :  { %p2853_p3 = scmp.ne.s32.totalorder %s25_s25, %s2852_s10  ;;  %p2858_p5 = scmp.lt.s32.totalorder %s2852_s10, %s2852_s10 }
   0xb   :  { %p2859_p6 = por %p2858_p5, %p2857_p4 }
   0xd   :  { %p2860_p7 = pnand %p2859_p6, %p2853_p3 }
   0xf   :  { %2863 = shalt.err (!%p2860_p7)
}
  0x10   :  { %s2891_s11 = smov 512   ;;  %s2892_s12 = smov 32  }
  0x11   :  { %30 = dma.hbm_to_vmem [thread:$0]  %s3432_s2, 2048, %s25_s25, [#allocation5], %s2891_s11, %s2891_s11, %s2892_s12  }
  0x12   :  { %s2893_s15 = smov [#allocation6]   ;;  %s2864_s19 = scalar_lea.hbm %s3433_s3, 8192 }
  0x13   :  { %s36_s16 = sshll.u32 %s2893_s15, 4  ;;  %p2865_p8 = scmp.ne.s32.totalorder %s3433_s3, %s2864_s19  ;;  %s37_s16 = int_to_ptr.vmem [resolvable:$true] %s36_s16 }
  0x14   :  { %p2868_p9 = scmp.lt.u32.totalorder %s2864_s19, %s3433_s3 }
  0x16   :  { %p2870_p10 = pnand %p2868_p9, %p2865_p8 }
  0x18   :  { %2873 = shalt.err (!%p2870_p10)
}
  0x19   :  { %s2874_s24 = scalar_lea.vmem %s37_s16, 8192  ;;  %p2879_p12 = scmp.lt.s32.totalorder %s37_s16, %s37_s16 }
  0x1a   :  { %p2875_p11 = scmp.ne.s32.totalorder %s37_s16, %s2874_s24  ;;  %p2880_p13 = scmp.lt.s32.totalorder %s2874_s24, %s2874_s24 }
  0x1c   :  { %p2881_p0 = por %p2880_p13, %p2879_p12 }
  0x1e   :  { %p2882_p1 = pnand %p2881_p0, %p2875_p11 }
  0x20   :  { %2885 = shalt.err (!%p2882_p1)
}
  0x21   :  { %42 = dma.hbm_to_vmem [thread:$0]  %s3433_s3, 8192, %s37_s16, [#allocation7], %s2891_s11, %s2891_s11, %s2892_s12  }
  0x22   :  { %2886 = dma.done.wait [#allocation5], 2048  }
  0x23   :  { %2887 = vsyncadd [#allocation5], 4294965248 }
  0x24   :  { %2888 = dma.done.wait [#allocation7], 8192  }
  0x25   :  { %2889 = vsyncadd [#allocation7], 4294959104  ;;  %v2894_v0 = vmov 0.0   ;;  %v2895_v1 = vmov 0   ;;  %v58_v2 = vld [vmem:[#allocation4 + $0x8] sm:$0xff]  ;;  %v60_v4 = vld [vmem:[#allocation4 + $0x18] sm:$0xff]  ;;  %v75_v36 = vlaneseq }
  0x26   :  { %166 = vmatprep.mubr.f32.mxu0 %v2894_v0  ;;  %243 = vmatprep.mubr.f32.mxu1 %v2894_v0  ;;  %v62_v3 = vld [vmem:[#allocation4 + $0x28] sm:$0xff]  ;;  %v64_v6 = vld [vmem:[#allocation4 + $0x38] sm:$0xff]  ;;  %v57_v7 = vld [vmem:[#allocation4] sm:$0xff]  ;;  %vm95_vm0 = vcmask 261120   ;;  %vm314_vm2 = vcmask 130048   ;;  %vm2072_vm10 = vcmask 7168  }
  0x27   :  { %2708 = vset.pattern.permute.xlu0 %v2895_v1  ;;  %2709 = vset.pattern.permute.xlu1 %v2895_v1  ;;  %v2134_v5 = vpack.c.bf16 %v62_v3, %v58_v2  ;;  %v61_v8 = vld [vmem:[#allocation4 + $0x20] sm:$0xff]  ;;  %v2142_v9 = vpack.c.bf16 %v64_v6, %v60_v4  ;;  %v59_v11 = vld [vmem:[#allocation4 + $0x10] sm:$0xff]  ;;  %v66_v13 = vld [vmem:[#allocation4 + $0x48] sm:$0xff]  ;;  %v76_v37 = vshrl.u32 %v75_v36, 7  ;;  %v2999_v51 = vand.u32 127, %v75_v36 }
  0x28   :  { %v2136_v10 = vpack.c.bf16 %v61_v8, %v57_v7  ;;  %v63_v12 = vld [vmem:[#allocation4 + $0x30] sm:$0xff]  ;;  %v70_v15 = vld [vmem:[#allocation4 + $0x68] sm:$0xff]  ;;  %v68_v16 = vld [vmem:[#allocation4 + $0x58] sm:$0xff] }
  0x29   :  { %2135 = vmatprep.subr.bf16.mxu0 %v2134_v5  ;;  %v2144_v14 = vpack.c.bf16 %v63_v12, %v59_v11  ;;  %v72_v17 = vld [vmem:[#allocation4 + $0x78] sm:$0xff]  ;;  %2143 = vmatprep.subr.bf16.mxu1 %v2142_v9  ;;  %v2138_v18 = vpack.c.bf16 %v70_v15, %v66_v13  ;;  %v65_v20 = vld [vmem:[#allocation4 + $0x40] sm:$0xff]  ;;  %v67_v22 = vld [vmem:[#allocation4 + $0x50] sm:$0xff]  ;;  %v85_v38 = vsub.s32 2, %v76_v37  ;;  %v77_v39 = vsub.s32 0, %v76_v37 }
  0x2a   :  { %2137 = vmatpush1.bf16.msra.mxu0 %v2136_v10  ;;  %v2146_v19 = vpack.c.bf16 %v72_v17, %v68_v16  ;;  %v69_v21 = vld [vmem:[#allocation4 + $0x60] sm:$0xff]  ;;  %v71_v24 = vld [vmem:[#allocation4 + $0x70] sm:$0xff]  ;;  %v257_v29 = vld [vmem:[%s3430_s0 + $0x8] sm:$0xff]  ;;  %v89_v40 = vsub.s32 3, %v76_v37  ;;  %v81_v42 = vsub.s32 1, %v76_v37 }
  0x2b   :  { %2145 = vmatpush1.bf16.msra.mxu1 %v2144_v14  ;;  %v2140_v23 = vpack.c.bf16 %v69_v21, %v65_v20  ;;  %2139 = vmatprep.subr.bf16.mxu0 %v2138_v18  ;;  %v2148_v25 = vpack.c.bf16 %v71_v24, %v67_v22  ;;  %v256_v26 = vld [vmem:[%s3430_s0] sm:$0xff]  ;;  %v258_v27 = vld [vmem:[%s3430_s0 + $0x10] sm:$0xff]  ;;  %v259_v30 = vld [vmem:[%s3430_s0 + $0x18] sm:$0xff] }
  0x2c   :  { %2147 = vmatprep.subr.bf16.mxu1 %v2146_v19  ;;  %267 = vperm.xlu0 %2708, %v256_v26   ;;  %v55_v28 = vld [vmem:[%s3431_s1] sm:$0xff]  ;;  %v56_v31 = vld [vmem:[%s3431_s1 + $0x8] sm:$0xff]  ;;  %v262_v34 = vld [vmem:[%s3430_s0 + $0x30] sm:$0xff] }
  0x2d   :  { %273 = vperm.xlu1 %2709, %v258_v27   ;;  %v260_v32 = vld [vmem:[%s3430_s0 + $0x20] sm:$0xff]  ;;  %v261_v33 = vld [vmem:[%s3430_s0 + $0x28] sm:$0xff]  ;;  %v263_v35 = vld [vmem:[%s3430_s0 + $0x38] sm:$0xff] }
  0x2e   :  { %2141 = vmatpush1.bf16.msra.mxu0 %v2140_v23  ;;  %v73_v41 = vld [vmem:[%s3434_s4] sm:$0xf]  ;;  %v602_v59 = vld [vmem:[#allocation6 + $0x8] sm:$0xff]  ;;  %v604_v2 = vld [vmem:[#allocation6 + $0x18] sm:$0xff] }
  0x2f   :  { %2149 = vmatpush1.bf16.msra.mxu1 %v2148_v25  ;;  %v86_v44 = vrot.slane %v73_v41, %v85_v38  ;;  %v78_v45 = vrot.slane %v73_v41, %v77_v39  ;;  %v90_v48 = vrot.slane %v73_v41, %v89_v40  ;;  %v82_v49 = vrot.slane %v73_v41, %v81_v42  ;;  %v606_v60 = vld [vmem:[#allocation6 + $0x28] sm:$0xff]  ;;  %v608_v3 = vld [vmem:[#allocation6 + $0x38] sm:$0xff]  ;;  %v601_v10 = vld [vmem:[#allocation6] sm:$0xff] }
  0x30   :  { %270 = vperm.xlu0 %2708, %v257_v29   ;;  %v3002_v9 = vpack.c.bf16 %v606_v60, %v602_v59  ;;  %v605_v11 = vld [vmem:[#allocation6 + $0x20] sm:$0xff]  ;;  %v3004_v13 = vpack.c.bf16 %v608_v3, %v604_v2  ;;  %v603_v14 = vld [vmem:[#allocation6 + $0x10] sm:$0xff]  ;;  %v610_v16 = vld [vmem:[#allocation6 + $0x48] sm:$0xff] }
  0x31   :  { %2080 = vmatmul.mubr.msk.f32.vlgmr.msra.gmra.mrb[0].mxu0 %vm95_vm0, %v55_v28  ;;  %276 = vperm.xlu1 %2709, %v259_v30   ;;  %v607_v15 = vld [vmem:[#allocation6 + $0x30] sm:$0xff]  ;;  %v614_v17 = vld [vmem:[#allocation6 + $0x68] sm:$0xff]  ;;  %v3007_v19 = vpack.c.bf16 %v605_v11, %v601_v10  ;;  %v612_v20 = vld [vmem:[#allocation6 + $0x58] sm:$0xff] }
  0x32   :  { %2082 = vmatmul.mubr.msk.f32.vlgmr.msra.gmra.mrb[0].mxu1 %vm95_vm0, %v55_v28  ;;  %172 = vmatprep.mubr.f32.mxu0 %v2894_v0  ;;  %v616_v21 = vld [vmem:[#allocation6 + $0x78] sm:$0xff]  ;;  %v3010_v22 = vpack.c.bf16 %v607_v15, %v603_v14  ;;  %v609_v23 = vld [vmem:[#allocation6 + $0x40] sm:$0xff]  ;;  %v3013_v26 = vpack.c.bf16 %v614_v17, %v610_v16  ;;  %v611_v27 = vld [vmem:[#allocation6 + $0x50] sm:$0xff] }
  0x33   :  { %249 = vmatprep.mubr.f32.mxu1 %v2894_v0  ;;  %v613_v24 = vld [vmem:[#allocation6 + $0x60] sm:$0xff]  ;;  %v615_v28 = vld [vmem:[#allocation6 + $0x70] sm:$0xff]  ;;  %v3017_v29 = vpack.c.bf16 %v616_v21, %v612_v20  ;;  %v618_v30 = vld [vmem:[#allocation6 + $0x88] sm:$0xff] }
  0x34   :  { %279 = vperm.xlu0 %2708, %v260_v32   ;;  %v3026_v36 = vpack.c.bf16 %v615_v28, %v611_v27  ;;  %v617_v37 = vld [vmem:[#allocation6 + $0x80] sm:$0xff]  ;;  %v619_v41 = vld [vmem:[#allocation6 + $0x90] sm:$0xff]  ;;  %v634_v59 = vld [vmem:[#allocation6 + $0x108] sm:$0xff] }
  0x35   :  { %2081 = vmatmul.mubr.msk.f32.gmra.mrb[2].mxu0 %vm95_vm0, %v56_v31  ;;  %282 = vperm.xlu1 %2709, %v261_v33   ;;  %v3021_v33 = vpack.c.bf16 %v613_v24, %v609_v23  ;;  %v621_v38 = vld [vmem:[#allocation6 + $0xa0] sm:$0xff]  ;;  %v623_v42 = vld [vmem:[#allocation6 + $0xb0] sm:$0xff]  ;;  %v638_v60 = vld [vmem:[#allocation6 + $0x128] sm:$0xff] }
  0x36   :  { %2083 = vmatmul.mubr.msk.f32.gmra.mrb[2].mxu1 %vm95_vm0, %v56_v31  ;;  %403 = vmatprep.mubr.f32.mxu0 %v2894_v0  ;;  %v622_v31 = vld [vmem:[#allocation6 + $0xa8] sm:$0xff]  ;;  %v633_v2 = vld [vmem:[#allocation6 + $0x100] sm:$0xff]  ;;  %v644_v15 = vld [vmem:[#allocation6 + $0x158] sm:$0xff] }
  0x37   :  { %516 = vmatprep.mubr.f32.mxu1 %v2894_v0  ;;  %v3033_v40 = vpack.c.bf16 %v622_v31, %v618_v30  ;;  %v637_v3 = vld [vmem:[#allocation6 + $0x120] sm:$0xff]  ;;  %v642_v11 = vld [vmem:[#allocation6 + $0x148] sm:$0xff]  ;;  %v648_v16 = vld [vmem:[#allocation6 + $0x178] sm:$0xff] }
  0x38   :  { %285 = vperm.xlu0 %2708, %v262_v34   ;;  %v620_v34 = vld [vmem:[#allocation6 + $0x98] sm:$0xff]  ;;  %v3081_v14 = vpack.c.bf16 %v637_v3, %v633_v2  ;;  %v645_v20 = vld [vmem:[#allocation6 + $0x160] sm:$0xff]  ;;  %v647_v27 = vld [vmem:[#allocation6 + $0x170] sm:$0xff]  ;;  %v3097_v28 = vpack.c.bf16 %v648_v16, %v644_v15 }
  0x39   :  { %288 = vperm.xlu1 %2709, %v263_v35   ;;  %v624_v35 = vld [vmem:[#allocation6 + $0xb8] sm:$0xff]  ;;  %v650_v30 = vld [vmem:[#allocation6 + $0x188] sm:$0xff]  ;;  %v659_v3 = vld [vmem:[#allocation6 + $0x1d0] sm:$0xff] }
  0x3a   :  { %v654_v31 = vld [vmem:[#allocation6 + $0x1a8] sm:$0xff] }
  0xab   :  { %v268_v4 = vpop.permute.xlu0 %267 }
  0xac   :  { %vm290_vm1 = vcmp.eq.s32.totalorder %v268_v4, %v2999_v51  ;;  %v274_v32 = vpop.permute.xlu1 %273 }
  0xad   :  { %v2084_v18 = vsel %vm290_vm1, 1.0, %v2894_v0  ;;  %vm292_vm4 = vcmp.eq.s32.totalorder %v274_v32, %v2999_v51 }
  0xaf   :  { %v271_v25 = vpop.permute.xlu0 %270 }
  0xb0   :  { %vm291_vm3 = vcmp.eq.s32.totalorder %v271_v25, %v2999_v51  ;;  %v643_v25 = vld [vmem:[#allocation6 + $0x150] sm:$0xff] }
  0xb1   :  { %v2085_v39 = vsel %vm291_vm3, 1.0, %v2894_v0 }
  0xb3   :  { %v280_v4 = vpop.permute.xlu0 %279 }
  0xb4   :  { %vm294_vm6 = vcmp.eq.s32.totalorder %v280_v4, %v2999_v51  ;;  %v663_v4 = vld [vmem:[#allocation6 + $0x1f0] sm:$0xff] }
  0xb5   :  { %v2088_v21 = vsel %vm294_vm6, 1.0, %v2894_v0 }
  0xb7   :  { %v286_v32 = vpop.permute.xlu0 %285 }
  0xb8   :  { %vm296_vm8 = vcmp.eq.s32.totalorder %v286_v32, %v2999_v51 }
 0x104   :  { %v168_v43 = vpop.f32.mrb[0].mxu0 }
 0x105   :  { %v170_v46 = vpop.f32.mrb[1].mxu0  ;;  %v245_v47 = vpop.f32.mrb[0].mxu1  ;;  %v169_v54 = vadd.f32 %v168_v43, %v78_v45  ;;  %v3037_v43 = vpack.c.bf16 %v624_v35, %v620_v34  ;;  %v652_v35 = vld [vmem:[#allocation6 + $0x198] sm:$0xff] }
 0x106   :  { %v247_v50 = vpop.f32.mrb[1].mxu1  ;;  %v246_v52 = vadd.f32 %v245_v47, %v86_v44  ;;  %v171_v61 = vadd.f32 %v170_v46, %v82_v49  ;;  %v2086_v46 = vsel %vm292_vm4, 1.0, %v2894_v0  ;;  %v3044_v47 = vpack.c.bf16 %v621_v38, %v617_v37  ;;  %v656_v37 = vld [vmem:[#allocation6 + $0x1b8] sm:$0xff] }
 0x107   :  { %v248_v55 = vadd.f32 %v247_v50, %v90_v48  ;;  %v3048_v50 = vpack.c.bf16 %v623_v42, %v619_v41  ;;  %v3105_v38 = vpack.c.bf16 %v647_v27, %v643_v25  ;;  %v653_v41 = vld [vmem:[#allocation6 + $0x1a0] sm:$0xff] }
 0x108   :  { %v174_v53 = vpop.f32.mrb[2].mxu0 }
 0x109   :  { %v175_v56 = vadd.f32 %v174_v53, %v78_v45  ;;  %v251_v57 = vpop.f32.mrb[2].mxu1  ;;  %v176_v58 = vpop.f32.mrb[3].mxu0  ;;  %v630_v45 = vld [vmem:[#allocation6 + $0xe8] sm:$0xff]  ;;  %v629_v53 = vld [vmem:[#allocation6 + $0xe0] sm:$0xff] }
 0x10a   :  { %v252_v62 = vadd.f32 %v251_v57, %v86_v44  ;;  %v177_v63 = vadd.f32 %v176_v58, %v82_v49  ;;  %v253_v1 = vpop.f32.mrb[3].mxu1  ;;  %v626_v44 = vld [vmem:[#allocation6 + $0xc8] sm:$0xff]  ;;  %v632_v49 = vld [vmem:[#allocation6 + $0xf8] sm:$0xff]  ;;  %v631_v57 = vld [vmem:[#allocation6 + $0xf0] sm:$0xff] }
 0x10b   :  { %v2152_v5 = vpack.c.bf16 %v175_v56, %v169_v54  ;;  %v254_v6 = vadd.f32 %v253_v1, %v90_v48  ;;  %v628_v48 = vld [vmem:[#allocation6 + $0xd8] sm:$0xff]  ;;  %v277_v54 = vpop.permute.xlu1 %276  ;;  %v627_v56 = vld [vmem:[#allocation6 + $0xd0] sm:$0xff] }
 0x10c   :  { %v2156_v7 = vpack.c.bf16 %v252_v62, %v246_v52  ;;  %v2150_v8 = vpack.c.bf16 %v177_v63, %v171_v61  ;;  %v625_v52 = vld [vmem:[#allocation6 + $0xc0] sm:$0xff]  ;;  %vm293_vm5 = vcmp.eq.s32.totalorder %v277_v54, %v2999_v51  ;;  %v3057_v58 = vpack.c.bf16 %v632_v49, %v628_v48  ;;  %v636_v62 = vld [vmem:[#allocation6 + $0x118] sm:$0xff]  ;;  %v658_v49 = vld [vmem:[#allocation6 + $0x1c8] sm:$0xff] }
 0x10d   :  { %v2154_v12 = vpack.c.bf16 %v254_v6, %v248_v55  ;;  %v3052_v55 = vpack.c.bf16 %v630_v45, %v626_v44  ;;  %v3061_v61 = vpack.c.bf16 %v629_v53, %v625_v52  ;;  %v640_v63 = vld [vmem:[#allocation6 + $0x138] sm:$0xff]  ;;  %v3065_v1 = vpack.c.bf16 %v631_v57, %v627_v56  ;;  %v651_v45 = vld [vmem:[#allocation6 + $0x190] sm:$0xff]  ;;  %v662_v52 = vld [vmem:[#allocation6 + $0x1e8] sm:$0xff] }
 0x10e   :  { %2151 = vmatprep.subr.bf16.mxu0 %v2150_v8  ;;  %v3072_v6 = vpack.c.bf16 %v638_v60, %v634_v59  ;;  %v639_v8 = vld [vmem:[#allocation6 + $0x130] sm:$0xff]  ;;  %v3077_v10 = vpack.c.bf16 %v640_v63, %v636_v62  ;;  %v3112_v44 = vpack.c.bf16 %v654_v31, %v650_v30  ;;  %v3117_v48 = vpack.c.bf16 %v656_v37, %v652_v35  ;;  %v660_v56 = vld [vmem:[#allocation6 + $0x1d8] sm:$0xff]  ;;  %v657_v60 = vld [vmem:[#allocation6 + $0x1c0] sm:$0xff] }
 0x10f   :  { %2155 = vmatprep.subr.bf16.mxu1 %v2154_v12  ;;  %2153 = vmatpush1.bf16.msra.mxu0 %v2152_v5  ;;  %v2087_v5 = vsel %vm293_vm5, 1.0, %v2894_v0  ;;  %v646_v12 = vld [vmem:[#allocation6 + $0x168] sm:$0xff]  ;;  %v283_v23 = vpop.permute.xlu1 %282  ;;  %v664_v57 = vld [vmem:[#allocation6 + $0x1f8] sm:$0xff]  ;;  %v661_v62 = vld [vmem:[#allocation6 + $0x1e0] sm:$0xff]  ;;  %v2090_v63 = vsel %vm296_vm8, 1.0, %v2894_v0  ;;  %v3132_v2 = vpack.c.bf16 %v662_v52, %v658_v49 }
 0x110   :  { %2157 = vmatpush1.bf16.msra.mxu1 %v2156_v7  ;;  %2159 = vmatprep.subr.bf16.mxu0 %v3002_v9  ;;  %v635_v7 = vld [vmem:[#allocation6 + $0x110] sm:$0xff]  ;;  %v3092_v24 = vpack.c.bf16 %v646_v12, %v642_v11  ;;  %vm295_vm7 = vcmp.eq.s32.totalorder %v283_v23, %v2999_v51 }
 0x111   :  { %2191 = vmatprep.subr.bf16.mxu1 %v3004_v13  ;;  %v3085_v17 = vpack.c.bf16 %v639_v8, %v635_v7  ;;  %v2089_v42 = vsel %vm295_vm7, 1.0, %v2894_v0  ;;  %v3141_v7 = vpack.c.bf16 %v661_v62, %v657_v60  ;;  %v3145_v8 = vpack.c.bf16 %v663_v4, %v659_v3 }
 0x112   :  { %2092 = vmatmul.mubr.msk.f32.vlgmr.msra.gmra.mrb[4].mxu0 %vm314_vm2, %v2084_v18 }
 0x113   :  { %2100 = vmatmul.mubr.msk.f32.vlgmr.msra.gmra.mrb[4].mxu1 %vm314_vm2, %v2084_v18  ;;  %2161 = vmatpush1.bf16.msra.mxu0 %v3007_v19  ;;  %v641_v18 = vld [vmem:[#allocation6 + $0x140] sm:$0xff]  ;;  %v289_v53 = vpop.permute.xlu1 %288 }
 0x114   :  { %2193 = vmatpush1.bf16.msra.mxu1 %v3010_v22  ;;  %409 = vmatprep.mubr.f32.mxu0 %v2894_v0  ;;  %v3101_v34 = vpack.c.bf16 %v645_v20, %v641_v18  ;;  %vm297_vm9 = vcmp.eq.s32.totalorder %v289_v53, %v2999_v51 }
 0x115   :  { %522 = vmatprep.mubr.f32.mxu1 %v2894_v0  ;;  %2163 = vmatprep.subr.bf16.mxu0 %v3013_v26  ;;  %v2091_v51 = vsel %vm297_vm9, 1.0, %v2894_v0 }
 0x116   :  { %2093 = vmatmul.mubr.msk.f32.gmra.mrb[6].mxu0 %vm314_vm2, %v2085_v39  ;;  %2195 = vmatprep.subr.bf16.mxu1 %v3017_v29 }
 0x117   :  { %2101 = vmatmul.mubr.msk.f32.gmra.mrb[6].mxu1 %vm314_vm2, %v2085_v39  ;;  %2165 = vmatpush1.bf16.msra.mxu0 %v3021_v33  ;;  %v649_v39 = vld [vmem:[#allocation6 + $0x180] sm:$0xff] }
 0x118   :  { %2197 = vmatpush1.bf16.msra.mxu1 %v3026_v36  ;;  %415 = vmatprep.mubr.f32.mxu0 %v2894_v0  ;;  %v3121_v54 = vpack.c.bf16 %v653_v41, %v649_v39 }
 0x119   :  { %528 = vmatprep.mubr.f32.mxu1 %v2894_v0  ;;  %2167 = vmatprep.subr.bf16.mxu0 %v3033_v40 }
 0x11a   :  { %2094 = vmatmul.mubr.msk.f32.gmra.mrb[8].mxu0 %vm314_vm2, %v2086_v46  ;;  %2199 = vmatprep.subr.bf16.mxu1 %v3037_v43 }
 0x11b   :  { %2102 = vmatmul.mubr.msk.f32.gmra.mrb[8].mxu1 %vm314_vm2, %v2086_v46  ;;  %2169 = vmatpush1.bf16.msra.mxu0 %v3044_v47  ;;  %v655_v46 = vld [vmem:[#allocation6 + $0x1b0] sm:$0xff] }
 0x11c   :  { %2201 = vmatpush1.bf16.msra.mxu1 %v3048_v50  ;;  %421 = vmatprep.mubr.f32.mxu0 %v2894_v0  ;;  %v3125_v59 = vpack.c.bf16 %v655_v46, %v651_v45 }
 0x11d   :  { %534 = vmatprep.mubr.f32.mxu1 %v2894_v0  ;;  %2171 = vmatprep.subr.bf16.mxu0 %v3052_v55 }
 0x11e   :  { %2095 = vmatmul.mubr.msk.f32.gmra.mrb[10].mxu0 %vm314_vm2, %v2087_v5  ;;  %2203 = vmatprep.subr.bf16.mxu1 %v3057_v58 }
 0x11f   :  { %2103 = vmatmul.mubr.msk.f32.gmra.mrb[10].mxu1 %vm314_vm2, %v2087_v5  ;;  %2173 = vmatpush1.bf16.msra.mxu0 %v3061_v61  ;;  %v3137_v5 = vpack.c.bf16 %v664_v57, %v660_v56 }
 0x120   :  { %2205 = vmatpush1.bf16.msra.mxu1 %v3065_v1  ;;  %427 = vmatprep.mubr.f32.mxu0 %v2894_v0 }
 0x121   :  { %540 = vmatprep.mubr.f32.mxu1 %v2894_v0  ;;  %2175 = vmatprep.subr.bf16.mxu0 %v3072_v6 }
 0x122   :  { %2096 = vmatmul.mubr.msk.f32.gmra.mrb[12].mxu0 %vm314_vm2, %v2088_v21  ;;  %2207 = vmatprep.subr.bf16.mxu1 %v3077_v10 }
 0x123   :  { %2104 = vmatmul.mubr.msk.f32.gmra.mrb[12].mxu1 %vm314_vm2, %v2088_v21  ;;  %2177 = vmatpush1.bf16.msra.mxu0 %v3081_v14 }
 0x124   :  { %2209 = vmatpush1.bf16.msra.mxu1 %v3085_v17  ;;  %433 = vmatprep.mubr.f32.mxu0 %v2894_v0 }
 0x125   :  { %546 = vmatprep.mubr.f32.mxu1 %v2894_v0  ;;  %2179 = vmatprep.subr.bf16.mxu0 %v3092_v24 }
 0x126   :  { %2097 = vmatmul.mubr.msk.f32.gmra.mrb[14].mxu0 %vm314_vm2, %v2089_v42  ;;  %2211 = vmatprep.subr.bf16.mxu1 %v3097_v28 }
 0x127   :  { %2105 = vmatmul.mubr.msk.f32.gmra.mrb[14].mxu1 %vm314_vm2, %v2089_v42  ;;  %2181 = vmatpush1.bf16.msra.mxu0 %v3101_v34 }
 0x128   :  { %2213 = vmatpush1.bf16.msra.mxu1 %v3105_v38  ;;  %439 = vmatprep.mubr.f32.mxu0 %v2894_v0 }
 0x129   :  { %552 = vmatprep.mubr.f32.mxu1 %v2894_v0  ;;  %2183 = vmatprep.subr.bf16.mxu0 %v3112_v44 }
 0x12a   :  { %2098 = vmatmul.mubr.msk.f32.gmra.mrb[16].mxu0 %vm314_vm2, %v2090_v63  ;;  %2215 = vmatprep.subr.bf16.mxu1 %v3117_v48 }
 0x12b   :  { %2106 = vmatmul.mubr.msk.f32.gmra.mrb[16].mxu1 %vm314_vm2, %v2090_v63  ;;  %2185 = vmatpush1.bf16.msra.mxu0 %v3121_v54 }
 0x12c   :  { %2217 = vmatpush1.bf16.msra.mxu1 %v3125_v59  ;;  %445 = vmatprep.mubr.f32.mxu0 %v2894_v0 }
 0x12d   :  { %558 = vmatprep.mubr.f32.mxu1 %v2894_v0  ;;  %2187 = vmatprep.subr.bf16.mxu0 %v3132_v2 }
 0x12e   :  { %2099 = vmatmul.mubr.msk.f32.gmra.mrb[18].mxu0 %vm314_vm2, %v2091_v51  ;;  %2219 = vmatprep.subr.bf16.mxu1 %v3137_v5 }
 0x12f   :  { %2107 = vmatmul.mubr.msk.f32.gmra.mrb[18].mxu1 %vm314_vm2, %v2091_v51  ;;  %2189 = vmatpush1.bf16.msra.mxu0 %v3141_v7 }
 0x130   :  { %2221 = vmatpush1.bf16.msra.mxu1 %v3145_v8  ;;  %729 = vmatprep.mubr.f32.mxu0 %v2894_v0 }
 0x131   :  { %800 = vmatprep.mubr.f32.mxu1 %v2894_v0  ;;  %2223 = vmatprep.subr.bf16.mxu0 %v3002_v9 }
 0x132   :  { %730 = vmatmul.mubr.f32.vlgmr.msra.gmra.mrb[4].mxu0 %v2894_v0  ;;  %2255 = vmatprep.subr.bf16.mxu1 %v3004_v13 }
 0x133   :  { %801 = vmatmul.mubr.f32.vlgmr.msra.gmra.mrb[4].mxu1 %v2894_v0  ;;  %2225 = vmatpush1.bf16.msra.mxu0 %v3007_v19 }
 0x134   :  { %2257 = vmatpush1.bf16.msra.mxu1 %v3010_v22  ;;  %2227 = vmatprep.subr.bf16.mxu0 %v3013_v26 }
 0x135   :  { %2259 = vmatprep.subr.bf16.mxu1 %v3017_v29  ;;  %903 = vmatprep.mubr.f32.mxu0 %v2894_v0 }
 0x136   :  { %974 = vmatprep.mubr.f32.mxu1 %v2894_v0 }
 0x137   :  { %2229 = vmatpush1.bf16.msra.mxu0 %v3021_v33 }
 0x138   :  { %2261 = vmatpush1.bf16.msra.mxu1 %v3026_v36  ;;  %2231 = vmatprep.subr.bf16.mxu0 %v3033_v40 }
 0x139   :  { %2263 = vmatprep.subr.bf16.mxu1 %v3037_v43 }
 0x13b   :  { %2233 = vmatpush1.bf16.msra.mxu0 %v3044_v47 }
 0x13c   :  { %2265 = vmatpush1.bf16.msra.mxu1 %v3048_v50  ;;  %2235 = vmatprep.subr.bf16.mxu0 %v3052_v55 }
 0x13d   :  { %2267 = vmatprep.subr.bf16.mxu1 %v3057_v58 }
 0x13f   :  { %2237 = vmatpush1.bf16.msra.mxu0 %v3061_v61 }
 0x140   :  { %2269 = vmatpush1.bf16.msra.mxu1 %v3065_v1  ;;  %2239 = vmatprep.subr.bf16.mxu0 %v3072_v6 }
 0x141   :  { %2271 = vmatprep.subr.bf16.mxu1 %v3077_v10 }
 0x143   :  { %2241 = vmatpush1.bf16.msra.mxu0 %v3081_v14 }
 0x144   :  { %2273 = vmatpush1.bf16.msra.mxu1 %v3085_v17  ;;  %2243 = vmatprep.subr.bf16.mxu0 %v3092_v24 }
 0x145   :  { %2275 = vmatprep.subr.bf16.mxu1 %v3097_v28 }
 0x147   :  { %2245 = vmatpush1.bf16.msra.mxu0 %v3101_v34 }
 0x148   :  { %2277 = vmatpush1.bf16.msra.mxu1 %v3105_v38  ;;  %2247 = vmatprep.subr.bf16.mxu0 %v3112_v44 }
 0x149   :  { %2279 = vmatprep.subr.bf16.mxu1 %v3117_v48 }
 0x14b   :  { %2249 = vmatpush1.bf16.msra.mxu0 %v3121_v54 }
 0x14c   :  { %2281 = vmatpush1.bf16.msra.mxu1 %v3125_v59  ;;  %2251 = vmatprep.subr.bf16.mxu0 %v3132_v2 }
 0x14d   :  { %2283 = vmatprep.subr.bf16.mxu1 %v3137_v5 }
 0x14f   :  { %2253 = vmatpush1.bf16.msra.mxu0 %v3141_v7 }
 0x150   :  { %2285 = vmatpush1.bf16.msra.mxu1 %v3145_v8  ;;  %2287 = vmatprep.subr.bf16.mxu0 %v3002_v9 }
 0x151   :  { %2319 = vmatprep.subr.bf16.mxu1 %v3004_v13 }
 0x205   :  { %v731_v11 = vpop.f32.mrb[4].mxu0 }
 0x206   :  { %v2108_v12 = vmul.f32 -1.442695, %v731_v11  ;;  %v802_v15 = vpop.f32.mrb[4].mxu1  ;;  %v733_v16 = vpop.f32.mrb[5].mxu0 }
 0x207   :  { %v2109_v18 = vmul.f32 -1.442695, %v733_v16  ;;  %v804_v20 = vpop.f32.mrb[5].mxu1  ;;  %v2110_v21 = vmul.f32 -1.442695, %v802_v15 }
 0x208   :  { %2710 = vpow2.f32 %v2108_v12 }
 0x209   :  { %2712 = vpow2.f32 %v2109_v18 }
 0x20a   :  { %2714 = vpow2.f32 %v2110_v21 }
 0x20b   :  { %2716 = vtanh.f32 %v804_v20 }
 0x212   :  { %v2711_v23 = vpop.eup %2710 }
 0x213   :  { %v820_v25 = vadd.f32 1.0, %v2711_v23  ;;  %v2713_v27 = vpop.eup %2712 }
 0x214   :  { %v821_v30 = vadd.f32 1.0, %v2713_v27  ;;  %v2715_v31 = vpop.eup %2714 }
 0x215   :  { %2718 = vrcp.f32 %v820_v25  ;;  %v2717_v32 = vpop.eup %2716  ;;  %v822_v41 = vadd.f32 1.0, %v2715_v31 }
 0x216   :  { %2720 = vrcp.f32 %v821_v30 }
 0x217   :  { %2722 = vrcp.f32 %v822_v41 }
 0x21f   :  { %v2719_v35 = vpop.eup %2718 }
 0x220   :  { %v831_v37 = vmul.f32 %v2719_v35, %v2717_v32  ;;  %v2721_v39 = vpop.eup %2720 }
 0x221   :  { %v830_v42 = vmul.f32 0.0, %v2721_v39  ;;  %v2723_v46 = vpop.eup %2722 }
 0x223   :  { %v3195_v45 = vadd.f32 %v831_v37, %v830_v42 }
 0x225   :  { %2724 = vtanh.f32 %v3195_v45 }
 0x22f   :  { %v2725_v49 = vpop.eup %2724 }
 0x230   :  { %v834_v52 = vmul.f32 %v2725_v49, %v2723_v46 }
 0x232   :  { %904 = vmatmul.mubr.f32.vlgmr.msra.gmra.mrb[6].mxu0 %v834_v52  ;;  %975 = vmatmul.mubr.f32.vlgmr.msra.gmra.mrb[6].mxu1 %v834_v52 }
 0x233   :  { %2289 = vmatpush1.bf16.msra.mxu0 %v3007_v19  ;;  %2321 = vmatpush1.bf16.msra.mxu1 %v3010_v22 }
 0x234   :  { %2291 = vmatprep.subr.bf16.mxu0 %v3013_v26  ;;  %2323 = vmatprep.subr.bf16.mxu1 %v3017_v29 }
 0x235   :  { %1077 = vmatprep.mubr.f32.mxu0 %v2894_v0  ;;  %1148 = vmatprep.mubr.f32.mxu1 %v2894_v0 }
 0x237   :  { %2293 = vmatpush1.bf16.msra.mxu0 %v3021_v33  ;;  %2325 = vmatpush1.bf16.msra.mxu1 %v3026_v36 }
 0x238   :  { %2295 = vmatprep.subr.bf16.mxu0 %v3033_v40  ;;  %2327 = vmatprep.subr.bf16.mxu1 %v3037_v43 }
 0x23b   :  { %2297 = vmatpush1.bf16.msra.mxu0 %v3044_v47  ;;  %2329 = vmatpush1.bf16.msra.mxu1 %v3048_v50 }
 0x23c   :  { %2299 = vmatprep.subr.bf16.mxu0 %v3052_v55  ;;  %2331 = vmatprep.subr.bf16.mxu1 %v3057_v58 }
 0x23f   :  { %2301 = vmatpush1.bf16.msra.mxu0 %v3061_v61  ;;  %2333 = vmatpush1.bf16.msra.mxu1 %v3065_v1 }
 0x240   :  { %2303 = vmatprep.subr.bf16.mxu0 %v3072_v6  ;;  %2335 = vmatprep.subr.bf16.mxu1 %v3077_v10 }
 0x243   :  { %2305 = vmatpush1.bf16.msra.mxu0 %v3081_v14  ;;  %2337 = vmatpush1.bf16.msra.mxu1 %v3085_v17 }
 0x244   :  { %2307 = vmatprep.subr.bf16.mxu0 %v3092_v24  ;;  %2339 = vmatprep.subr.bf16.mxu1 %v3097_v28 }
 0x247   :  { %2309 = vmatpush1.bf16.msra.mxu0 %v3101_v34  ;;  %2341 = vmatpush1.bf16.msra.mxu1 %v3105_v38 }
 0x248   :  { %2311 = vmatprep.subr.bf16.mxu0 %v3112_v44  ;;  %2343 = vmatprep.subr.bf16.mxu1 %v3117_v48 }
 0x24b   :  { %2313 = vmatpush1.bf16.msra.mxu0 %v3121_v54  ;;  %2345 = vmatpush1.bf16.msra.mxu1 %v3125_v59 }
 0x24c   :  { %2315 = vmatprep.subr.bf16.mxu0 %v3132_v2  ;;  %2347 = vmatprep.subr.bf16.mxu1 %v3137_v5 }
 0x24f   :  { %2317 = vmatpush1.bf16.msra.mxu0 %v3141_v7  ;;  %2349 = vmatpush1.bf16.msra.mxu1 %v3145_v8 }
 0x250   :  { %2351 = vmatprep.subr.bf16.mxu0 %v3002_v9  ;;  %2383 = vmatprep.subr.bf16.mxu1 %v3004_v13 }
 0x305   :  { %v905_v53 = vpop.f32.mrb[6].mxu0  ;;  %v976_v56 = vpop.f32.mrb[6].mxu1 }
 0x306   :  { %v2111_v57 = vmul.f32 -1.442695, %v905_v53  ;;  %v907_v60 = vpop.f32.mrb[7].mxu0  ;;  %v978_v62 = vpop.f32.mrb[7].mxu1  ;;  %v2113_v3 = vmul.f32 -1.442695, %v976_v56 }
 0x307   :  { %v2112_v63 = vmul.f32 -1.442695, %v907_v60 }
 0x308   :  { %2726 = vpow2.f32 %v2111_v57 }
 0x309   :  { %2728 = vpow2.f32 %v2112_v63 }
 0x30a   :  { %2730 = vtanh.f32 %v978_v62 }
 0x30b   :  { %2732 = vpow2.f32 %v2113_v3 }
 0x312   :  { %v2727_v4 = vpop.eup %2726 }
 0x313   :  { %v994_v51 = vadd.f32 1.0, %v2727_v4  ;;  %v2729_v11 = vpop.eup %2728 }
 0x314   :  { %v995_v12 = vadd.f32 1.0, %v2729_v11  ;;  %v2731_v15 = vpop.eup %2730 }
 0x315   :  { %2734 = vrcp.f32 %v994_v51  ;;  %v2733_v16 = vpop.eup %2732 }
 0x316   :  { %2736 = vrcp.f32 %v995_v12  ;;  %v996_v23 = vadd.f32 1.0, %v2733_v16 }
 0x318   :  { %2738 = vrcp.f32 %v996_v23 }
 0x31f   :  { %v2735_v18 = vpop.eup %2734 }
 0x320   :  { %v1005_v20 = vmul.f32 %v2735_v18, %v2731_v15  ;;  %v2737_v21 = vpop.eup %2736 }
 0x321   :  { %v1004_v25 = vmul.f32 %v2737_v21, %v3195_v45 }
 0x322   :  { %v2739_v30 = vpop.eup %2738 }
 0x323   :  { %v3233_v27 = vadd.f32 %v1005_v20, %v1004_v25 }
 0x325   :  { %2740 = vtanh.f32 %v3233_v27 }
 0x32f   :  { %v2741_v31 = vpop.eup %2740 }
 0x330   :  { %v1008_v32 = vmul.f32 %v2741_v31, %v2739_v30 }
 0x332   :  { %1078 = vmatmul.mubr.f32.vlgmr.msra.gmra.mrb[8].mxu0 %v1008_v32  ;;  %1149 = vmatmul.mubr.f32.vlgmr.msra.gmra.mrb[8].mxu1 %v1008_v32 }
 0x333   :  { %2353 = vmatpush1.bf16.msra.mxu0 %v3007_v19  ;;  %2385 = vmatpush1.bf16.msra.mxu1 %v3010_v22 }
 0x334   :  { %2355 = vmatprep.subr.bf16.mxu0 %v3013_v26  ;;  %2387 = vmatprep.subr.bf16.mxu1 %v3017_v29 }
 0x335   :  { %1251 = vmatprep.mubr.f32.mxu0 %v2894_v0  ;;  %1322 = vmatprep.mubr.f32.mxu1 %v2894_v0 }
 0x337   :  { %2357 = vmatpush1.bf16.msra.mxu0 %v3021_v33  ;;  %2389 = vmatpush1.bf16.msra.mxu1 %v3026_v36 }
 0x338   :  { %2359 = vmatprep.subr.bf16.mxu0 %v3033_v40  ;;  %2391 = vmatprep.subr.bf16.mxu1 %v3037_v43 }
 0x33b   :  { %2361 = vmatpush1.bf16.msra.mxu0 %v3044_v47  ;;  %2393 = vmatpush1.bf16.msra.mxu1 %v3048_v50 }
 0x33c   :  { %2363 = vmatprep.subr.bf16.mxu0 %v3052_v55  ;;  %2395 = vmatprep.subr.bf16.mxu1 %v3057_v58 }
 0x33f   :  { %2365 = vmatpush1.bf16.msra.mxu0 %v3061_v61  ;;  %2397 = vmatpush1.bf16.msra.mxu1 %v3065_v1 }
 0x340   :  { %2367 = vmatprep.subr.bf16.mxu0 %v3072_v6  ;;  %2399 = vmatprep.subr.bf16.mxu1 %v3077_v10 }
 0x343   :  { %2369 = vmatpush1.bf16.msra.mxu0 %v3081_v14  ;;  %2401 = vmatpush1.bf16.msra.mxu1 %v3085_v17 }
 0x344   :  { %2371 = vmatprep.subr.bf16.mxu0 %v3092_v24  ;;  %2403 = vmatprep.subr.bf16.mxu1 %v3097_v28 }
 0x347   :  { %2373 = vmatpush1.bf16.msra.mxu0 %v3101_v34  ;;  %2405 = vmatpush1.bf16.msra.mxu1 %v3105_v38 }
 0x348   :  { %2375 = vmatprep.subr.bf16.mxu0 %v3112_v44  ;;  %2407 = vmatprep.subr.bf16.mxu1 %v3117_v48 }
 0x34b   :  { %2377 = vmatpush1.bf16.msra.mxu0 %v3121_v54  ;;  %2409 = vmatpush1.bf16.msra.mxu1 %v3125_v59 }
 0x34c   :  { %2379 = vmatprep.subr.bf16.mxu0 %v3132_v2  ;;  %2411 = vmatprep.subr.bf16.mxu1 %v3137_v5 }
 0x34f   :  { %2381 = vmatpush1.bf16.msra.mxu0 %v3141_v7  ;;  %2413 = vmatpush1.bf16.msra.mxu1 %v3145_v8 }
 0x350   :  { %2415 = vmatprep.subr.bf16.mxu0 %v3002_v9  ;;  %2447 = vmatprep.subr.bf16.mxu1 %v3004_v13 }
 0x405   :  { %v1079_v35 = vpop.f32.mrb[8].mxu0  ;;  %v1150_v37 = vpop.f32.mrb[8].mxu1 }
 0x406   :  { %v2114_v39 = vmul.f32 -1.442695, %v1079_v35  ;;  %v1081_v41 = vpop.f32.mrb[9].mxu0  ;;  %v1152_v42 = vpop.f32.mrb[9].mxu1  ;;  %v2116_v46 = vmul.f32 -1.442695, %v1150_v37 }
 0x407   :  { %v2115_v45 = vmul.f32 -1.442695, %v1081_v41 }
 0x408   :  { %2742 = vpow2.f32 %v2114_v39 }
 0x409   :  { %2744 = vpow2.f32 %v2115_v45 }
 0x40a   :  { %2746 = vtanh.f32 %v1152_v42 }
 0x40b   :  { %2748 = vpow2.f32 %v2116_v46 }
 0x412   :  { %v2743_v49 = vpop.eup %2742 }
 0x413   :  { %v1168_v52 = vadd.f32 1.0, %v2743_v49  ;;  %v2745_v53 = vpop.eup %2744 }
 0x414   :  { %v1169_v56 = vadd.f32 1.0, %v2745_v53  ;;  %v2747_v57 = vpop.eup %2746 }
 0x415   :  { %2750 = vrcp.f32 %v1168_v52  ;;  %v2749_v60 = vpop.eup %2748 }
 0x416   :  { %2752 = vrcp.f32 %v1169_v56  ;;  %v1170_v4 = vadd.f32 1.0, %v2749_v60 }
 0x418   :  { %2754 = vrcp.f32 %v1170_v4 }
 0x41f   :  { %v2751_v62 = vpop.eup %2750 }
 0x420   :  { %v1179_v63 = vmul.f32 %v2751_v62, %v2747_v57  ;;  %v2753_v3 = vpop.eup %2752 }
 0x421   :  { %v1178_v51 = vmul.f32 %v2753_v3, %v3233_v27 }
 0x422   :  { %v2755_v12 = vpop.eup %2754 }
 0x423   :  { %v3271_v11 = vadd.f32 %v1179_v63, %v1178_v51 }
 0x425   :  { %2756 = vtanh.f32 %v3271_v11 }
 0x42f   :  { %v2757_v15 = vpop.eup %2756 }
 0x430   :  { %v1182_v16 = vmul.f32 %v2757_v15, %v2755_v12 }
 0x432   :  { %1252 = vmatmul.mubr.f32.vlgmr.msra.gmra.mrb[10].mxu0 %v1182_v16  ;;  %1323 = vmatmul.mubr.f32.vlgmr.msra.gmra.mrb[10].mxu1 %v1182_v16 }
 0x433   :  { %2417 = vmatpush1.bf16.msra.mxu0 %v3007_v19  ;;  %2449 = vmatpush1.bf16.msra.mxu1 %v3010_v22 }
 0x434   :  { %2419 = vmatprep.subr.bf16.mxu0 %v3013_v26  ;;  %2451 = vmatprep.subr.bf16.mxu1 %v3017_v29 }
 0x435   :  { %1425 = vmatprep.mubr.f32.mxu0 %v2894_v0  ;;  %1496 = vmatprep.mubr.f32.mxu1 %v2894_v0 }
 0x437   :  { %2421 = vmatpush1.bf16.msra.mxu0 %v3021_v33  ;;  %2453 = vmatpush1.bf16.msra.mxu1 %v3026_v36 }
 0x438   :  { %2423 = vmatprep.subr.bf16.mxu0 %v3033_v40  ;;  %2455 = vmatprep.subr.bf16.mxu1 %v3037_v43 }
 0x43b   :  { %2425 = vmatpush1.bf16.msra.mxu0 %v3044_v47  ;;  %2457 = vmatpush1.bf16.msra.mxu1 %v3048_v50 }
 0x43c   :  { %2427 = vmatprep.subr.bf16.mxu0 %v3052_v55  ;;  %2459 = vmatprep.subr.bf16.mxu1 %v3057_v58 }
 0x43f   :  { %2429 = vmatpush1.bf16.msra.mxu0 %v3061_v61  ;;  %2461 = vmatpush1.bf16.msra.mxu1 %v3065_v1 }
 0x440   :  { %2431 = vmatprep.subr.bf16.mxu0 %v3072_v6  ;;  %2463 = vmatprep.subr.bf16.mxu1 %v3077_v10 }
 0x443   :  { %2433 = vmatpush1.bf16.msra.mxu0 %v3081_v14  ;;  %2465 = vmatpush1.bf16.msra.mxu1 %v3085_v17 }
 0x444   :  { %2435 = vmatprep.subr.bf16.mxu0 %v3092_v24  ;;  %2467 = vmatprep.subr.bf16.mxu1 %v3097_v28 }
 0x447   :  { %2437 = vmatpush1.bf16.msra.mxu0 %v3101_v34  ;;  %2469 = vmatpush1.bf16.msra.mxu1 %v3105_v38 }
 0x448   :  { %2439 = vmatprep.subr.bf16.mxu0 %v3112_v44  ;;  %2471 = vmatprep.subr.bf16.mxu1 %v3117_v48 }
 0x44b   :  { %2441 = vmatpush1.bf16.msra.mxu0 %v3121_v54  ;;  %2473 = vmatpush1.bf16.msra.mxu1 %v3125_v59 }
 0x44c   :  { %2443 = vmatprep.subr.bf16.mxu0 %v3132_v2  ;;  %2475 = vmatprep.subr.bf16.mxu1 %v3137_v5 }
 0x44f   :  { %2445 = vmatpush1.bf16.msra.mxu0 %v3141_v7  ;;  %2477 = vmatpush1.bf16.msra.mxu1 %v3145_v8 }
 0x450   :  { %2479 = vmatprep.subr.bf16.mxu0 %v3002_v9  ;;  %2511 = vmatprep.subr.bf16.mxu1 %v3004_v13 }
 0x505   :  { %v1253_v18 = vpop.f32.mrb[10].mxu0  ;;  %v1324_v20 = vpop.f32.mrb[10].mxu1 }
 0x506   :  { %v2117_v21 = vmul.f32 -1.442695, %v1253_v18  ;;  %v1255_v23 = vpop.f32.mrb[11].mxu0  ;;  %v1326_v25 = vpop.f32.mrb[11].mxu1  ;;  %v2119_v30 = vmul.f32 -1.442695, %v1324_v20 }
 0x507   :  { %v2118_v27 = vmul.f32 -1.442695, %v1255_v23 }
 0x508   :  { %2758 = vpow2.f32 %v2117_v21 }
 0x509   :  { %2760 = vpow2.f32 %v2118_v27 }
 0x50a   :  { %2762 = vtanh.f32 %v1326_v25 }
 0x50b   :  { %2764 = vpow2.f32 %v2119_v30 }
 0x512   :  { %v2759_v31 = vpop.eup %2758 }
 0x513   :  { %v1342_v32 = vadd.f32 1.0, %v2759_v31  ;;  %v2761_v35 = vpop.eup %2760 }
 0x514   :  { %v1343_v37 = vadd.f32 1.0, %v2761_v35  ;;  %v2763_v39 = vpop.eup %2762 }
 0x515   :  { %2766 = vrcp.f32 %v1342_v32  ;;  %v2765_v41 = vpop.eup %2764 }
 0x516   :  { %2768 = vrcp.f32 %v1343_v37  ;;  %v1344_v49 = vadd.f32 1.0, %v2765_v41 }
 0x518   :  { %2770 = vrcp.f32 %v1344_v49 }
 0x51f   :  { %v2767_v42 = vpop.eup %2766 }
 0x520   :  { %v1353_v45 = vmul.f32 %v2767_v42, %v2763_v39  ;;  %v2769_v46 = vpop.eup %2768 }
 0x521   :  { %v1352_v52 = vmul.f32 %v2769_v46, %v3271_v11 }
 0x522   :  { %v2771_v56 = vpop.eup %2770 }
 0x523   :  { %v3309_v53 = vadd.f32 %v1353_v45, %v1352_v52 }
 0x525   :  { %2772 = vtanh.f32 %v3309_v53 }
 0x52f   :  { %v2773_v57 = vpop.eup %2772 }
 0x530   :  { %v1356_v60 = vmul.f32 %v2773_v57, %v2771_v56 }
 0x532   :  { %1426 = vmatmul.mubr.f32.vlgmr.msra.gmra.mrb[12].mxu0 %v1356_v60  ;;  %1497 = vmatmul.mubr.f32.vlgmr.msra.gmra.mrb[12].mxu1 %v1356_v60 }
 0x533   :  { %2481 = vmatpush1.bf16.msra.mxu0 %v3007_v19  ;;  %2513 = vmatpush1.bf16.msra.mxu1 %v3010_v22 }
 0x534   :  { %2483 = vmatprep.subr.bf16.mxu0 %v3013_v26  ;;  %2515 = vmatprep.subr.bf16.mxu1 %v3017_v29 }
 0x535   :  { %1599 = vmatprep.mubr.f32.mxu0 %v2894_v0  ;;  %1670 = vmatprep.mubr.f32.mxu1 %v2894_v0 }
 0x537   :  { %2485 = vmatpush1.bf16.msra.mxu0 %v3021_v33  ;;  %2517 = vmatpush1.bf16.msra.mxu1 %v3026_v36 }
 0x538   :  { %2487 = vmatprep.subr.bf16.mxu0 %v3033_v40  ;;  %2519 = vmatprep.subr.bf16.mxu1 %v3037_v43 }
 0x53b   :  { %2489 = vmatpush1.bf16.msra.mxu0 %v3044_v47  ;;  %2521 = vmatpush1.bf16.msra.mxu1 %v3048_v50 }
 0x53c   :  { %2491 = vmatprep.subr.bf16.mxu0 %v3052_v55  ;;  %2523 = vmatprep.subr.bf16.mxu1 %v3057_v58 }
 0x53f   :  { %2493 = vmatpush1.bf16.msra.mxu0 %v3061_v61  ;;  %2525 = vmatpush1.bf16.msra.mxu1 %v3065_v1 }
 0x540   :  { %2495 = vmatprep.subr.bf16.mxu0 %v3072_v6  ;;  %2527 = vmatprep.subr.bf16.mxu1 %v3077_v10 }
 0x543   :  { %2497 = vmatpush1.bf16.msra.mxu0 %v3081_v14  ;;  %2529 = vmatpush1.bf16.msra.mxu1 %v3085_v17 }
 0x544   :  { %2499 = vmatprep.subr.bf16.mxu0 %v3092_v24  ;;  %2531 = vmatprep.subr.bf16.mxu1 %v3097_v28 }
 0x547   :  { %2501 = vmatpush1.bf16.msra.mxu0 %v3101_v34  ;;  %2533 = vmatpush1.bf16.msra.mxu1 %v3105_v38 }
 0x548   :  { %2503 = vmatprep.subr.bf16.mxu0 %v3112_v44  ;;  %2535 = vmatprep.subr.bf16.mxu1 %v3117_v48 }
 0x54b   :  { %2505 = vmatpush1.bf16.msra.mxu0 %v3121_v54  ;;  %2537 = vmatpush1.bf16.msra.mxu1 %v3125_v59 }
 0x54c   :  { %2507 = vmatprep.subr.bf16.mxu0 %v3132_v2  ;;  %2539 = vmatprep.subr.bf16.mxu1 %v3137_v5 }
 0x54f   :  { %2509 = vmatpush1.bf16.msra.mxu0 %v3141_v7  ;;  %2541 = vmatpush1.bf16.msra.mxu1 %v3145_v8 }
 0x550   :  { %2543 = vmatprep.subr.bf16.mxu0 %v3002_v9  ;;  %2575 = vmatprep.subr.bf16.mxu1 %v3004_v13 }
 0x605   :  { %v1427_v62 = vpop.f32.mrb[12].mxu0  ;;  %v1498_v63 = vpop.f32.mrb[12].mxu1 }
 0x606   :  { %v2120_v3 = vmul.f32 -1.442695, %v1427_v62  ;;  %v1429_v4 = vpop.f32.mrb[13].mxu0  ;;  %v1500_v51 = vpop.f32.mrb[13].mxu1  ;;  %v2122_v12 = vmul.f32 -1.442695, %v1498_v63 }
 0x607   :  { %v2121_v11 = vmul.f32 -1.442695, %v1429_v4 }
 0x608   :  { %2774 = vpow2.f32 %v2120_v3 }
 0x609   :  { %2776 = vpow2.f32 %v2121_v11 }
 0x60a   :  { %2778 = vtanh.f32 %v1500_v51 }
 0x60b   :  { %2780 = vpow2.f32 %v2122_v12 }
 0x612   :  { %v2775_v15 = vpop.eup %2774 }
 0x613   :  { %v1516_v16 = vadd.f32 1.0, %v2775_v15  ;;  %v2777_v18 = vpop.eup %2776 }
 0x614   :  { %v1517_v20 = vadd.f32 1.0, %v2777_v18  ;;  %v2779_v21 = vpop.eup %2778 }
 0x615   :  { %2782 = vrcp.f32 %v1516_v16  ;;  %v2781_v23 = vpop.eup %2780 }
 0x616   :  { %2784 = vrcp.f32 %v1517_v20  ;;  %v1518_v31 = vadd.f32 1.0, %v2781_v23 }
 0x618   :  { %2786 = vrcp.f32 %v1518_v31 }
 0x61f   :  { %v2783_v25 = vpop.eup %2782 }
 0x620   :  { %v1527_v27 = vmul.f32 %v2783_v25, %v2779_v21  ;;  %v2785_v30 = vpop.eup %2784 }
 0x621   :  { %v1526_v32 = vmul.f32 %v2785_v30, %v3309_v53 }
 0x622   :  { %v2787_v37 = vpop.eup %2786 }
 0x623   :  { %v3347_v35 = vadd.f32 %v1527_v27, %v1526_v32 }
 0x625   :  { %2788 = vtanh.f32 %v3347_v35 }
 0x62f   :  { %v2789_v39 = vpop.eup %2788 }
 0x630   :  { %v1530_v41 = vmul.f32 %v2789_v39, %v2787_v37 }
 0x632   :  { %1600 = vmatmul.mubr.f32.vlgmr.msra.gmra.mrb[14].mxu0 %v1530_v41  ;;  %1671 = vmatmul.mubr.f32.vlgmr.msra.gmra.mrb[14].mxu1 %v1530_v41 }
 0x633   :  { %2545 = vmatpush1.bf16.msra.mxu0 %v3007_v19  ;;  %2577 = vmatpush1.bf16.msra.mxu1 %v3010_v22 }
 0x634   :  { %2547 = vmatprep.subr.bf16.mxu0 %v3013_v26  ;;  %2579 = vmatprep.subr.bf16.mxu1 %v3017_v29 }
 0x635   :  { %1773 = vmatprep.mubr.f32.mxu0 %v2894_v0  ;;  %1844 = vmatprep.mubr.f32.mxu1 %v2894_v0 }
 0x637   :  { %2549 = vmatpush1.bf16.msra.mxu0 %v3021_v33  ;;  %2581 = vmatpush1.bf16.msra.mxu1 %v3026_v36 }
 0x638   :  { %2551 = vmatprep.subr.bf16.mxu0 %v3033_v40  ;;  %2583 = vmatprep.subr.bf16.mxu1 %v3037_v43 }
 0x63b   :  { %2553 = vmatpush1.bf16.msra.mxu0 %v3044_v47  ;;  %2585 = vmatpush1.bf16.msra.mxu1 %v3048_v50 }
 0x63c   :  { %2555 = vmatprep.subr.bf16.mxu0 %v3052_v55  ;;  %2587 = vmatprep.subr.bf16.mxu1 %v3057_v58 }
 0x63f   :  { %2557 = vmatpush1.bf16.msra.mxu0 %v3061_v61  ;;  %2589 = vmatpush1.bf16.msra.mxu1 %v3065_v1 }
 0x640   :  { %2559 = vmatprep.subr.bf16.mxu0 %v3072_v6  ;;  %2591 = vmatprep.subr.bf16.mxu1 %v3077_v10 }
 0x643   :  { %2561 = vmatpush1.bf16.msra.mxu0 %v3081_v14  ;;  %2593 = vmatpush1.bf16.msra.mxu1 %v3085_v17 }
 0x644   :  { %2563 = vmatprep.subr.bf16.mxu0 %v3092_v24  ;;  %2595 = vmatprep.subr.bf16.mxu1 %v3097_v28 }
 0x647   :  { %2565 = vmatpush1.bf16.msra.mxu0 %v3101_v34  ;;  %2597 = vmatpush1.bf16.msra.mxu1 %v3105_v38 }
 0x648   :  { %2567 = vmatprep.subr.bf16.mxu0 %v3112_v44  ;;  %2599 = vmatprep.subr.bf16.mxu1 %v3117_v48 }
 0x64b   :  { %2569 = vmatpush1.bf16.msra.mxu0 %v3121_v54  ;;  %2601 = vmatpush1.bf16.msra.mxu1 %v3125_v59 }
 0x64c   :  { %2571 = vmatprep.subr.bf16.mxu0 %v3132_v2  ;;  %2603 = vmatprep.subr.bf16.mxu1 %v3137_v5 }
 0x64f   :  { %2573 = vmatpush1.bf16.msra.mxu0 %v3141_v7  ;;  %2605 = vmatpush1.bf16.msra.mxu1 %v3145_v8 }
 0x650   :  { %2607 = vmatprep.subr.bf16.mxu0 %v3002_v9  ;;  %2639 = vmatprep.subr.bf16.mxu1 %v3004_v13 }
 0x705   :  { %v1601_v42 = vpop.f32.mrb[14].mxu0  ;;  %v1672_v45 = vpop.f32.mrb[14].mxu1 }
 0x706   :  { %v2123_v46 = vmul.f32 -1.442695, %v1601_v42  ;;  %v1603_v49 = vpop.f32.mrb[15].mxu0  ;;  %v1674_v52 = vpop.f32.mrb[15].mxu1  ;;  %v2125_v56 = vmul.f32 -1.442695, %v1672_v45 }
 0x707   :  { %v2124_v53 = vmul.f32 -1.442695, %v1603_v49  ;;  %v2132_v45 = vld [vmem:[%s3435_s5] ss:$0 sm:$0xff] }
 0x708   :  { %2790 = vpow2.f32 %v2123_v46 }
 0x709   :  { %2792 = vpow2.f32 %v2124_v53 }
 0x70a   :  { %2794 = vtanh.f32 %v1674_v52  ;;  %v2064_v52 = vstv %s3436_s6 }
 0x70b   :  { %2796 = vpow2.f32 %v2125_v56 }
 0x712   :  { %v2791_v57 = vpop.eup %2790 }
 0x713   :  { %v1690_v60 = vadd.f32 1.0, %v2791_v57  ;;  %v2793_v62 = vpop.eup %2792 }
 0x714   :  { %v1691_v63 = vadd.f32 1.0, %v2793_v62  ;;  %v2795_v9 = vpop.eup %2794 }
 0x715   :  { %2798 = vrcp.f32 %v1690_v60  ;;  %v2797_v3 = vpop.eup %2796 }
 0x716   :  { %2800 = vrcp.f32 %v1691_v63  ;;  %v1692_v11 = vadd.f32 1.0, %v2797_v3 }
 0x718   :  { %2802 = vrcp.f32 %v1692_v11 }
 0x71f   :  { %v2799_v13 = vpop.eup %2798 }
 0x720   :  { %v1701_v4 = vmul.f32 %v2799_v13, %v2795_v9  ;;  %v2801_v51 = vpop.eup %2800 }
 0x721   :  { %v1700_v12 = vmul.f32 %v2801_v51, %v3347_v35 }
 0x722   :  { %v2803_v16 = vpop.eup %2802 }
 0x723   :  { %v3385_v15 = vadd.f32 %v1701_v4, %v1700_v12 }
 0x725   :  { %2804 = vtanh.f32 %v3385_v15 }
 0x72f   :  { %v2805_v18 = vpop.eup %2804 }
 0x730   :  { %v1704_v20 = vmul.f32 %v2805_v18, %v2803_v16 }
 0x732   :  { %1774 = vmatmul.mubr.f32.vlgmr.msra.gmra.mrb[16].mxu0 %v1704_v20  ;;  %1845 = vmatmul.mubr.f32.vlgmr.msra.gmra.mrb[16].mxu1 %v1704_v20 }
 0x733   :  { %2609 = vmatpush1.bf16.msra.mxu0 %v3007_v19  ;;  %2641 = vmatpush1.bf16.msra.mxu1 %v3010_v22 }
 0x734   :  { %2611 = vmatprep.subr.bf16.mxu0 %v3013_v26  ;;  %2643 = vmatprep.subr.bf16.mxu1 %v3017_v29 }
 0x735   :  { %1947 = vmatprep.mubr.f32.mxu0 %v2894_v0  ;;  %2018 = vmatprep.mubr.f32.mxu1 %v2894_v0 }
 0x737   :  { %2613 = vmatpush1.bf16.msra.mxu0 %v3021_v33  ;;  %2645 = vmatpush1.bf16.msra.mxu1 %v3026_v36 }
 0x738   :  { %2615 = vmatprep.subr.bf16.mxu0 %v3033_v40  ;;  %2647 = vmatprep.subr.bf16.mxu1 %v3037_v43 }
 0x73b   :  { %2617 = vmatpush1.bf16.msra.mxu0 %v3044_v47  ;;  %2649 = vmatpush1.bf16.msra.mxu1 %v3048_v50 }
 0x73c   :  { %2619 = vmatprep.subr.bf16.mxu0 %v3052_v55  ;;  %2651 = vmatprep.subr.bf16.mxu1 %v3057_v58 }
 0x73f   :  { %2621 = vmatpush1.bf16.msra.mxu0 %v3061_v61  ;;  %2653 = vmatpush1.bf16.msra.mxu1 %v3065_v1 }
 0x740   :  { %2623 = vmatprep.subr.bf16.mxu0 %v3072_v6  ;;  %2655 = vmatprep.subr.bf16.mxu1 %v3077_v10 }
 0x743   :  { %2625 = vmatpush1.bf16.msra.mxu0 %v3081_v14  ;;  %2657 = vmatpush1.bf16.msra.mxu1 %v3085_v17 }
 0x744   :  { %2627 = vmatprep.subr.bf16.mxu0 %v3092_v24  ;;  %2659 = vmatprep.subr.bf16.mxu1 %v3097_v28 }
 0x747   :  { %2629 = vmatpush1.bf16.msra.mxu0 %v3101_v34  ;;  %2661 = vmatpush1.bf16.msra.mxu1 %v3105_v38 }
 0x748   :  { %2631 = vmatprep.subr.bf16.mxu0 %v3112_v44  ;;  %2663 = vmatprep.subr.bf16.mxu1 %v3117_v48 }
 0x74b   :  { %2633 = vmatpush1.bf16.msra.mxu0 %v3121_v54  ;;  %2665 = vmatpush1.bf16.msra.mxu1 %v3125_v59 }
 0x74c   :  { %2635 = vmatprep.subr.bf16.mxu0 %v3132_v2  ;;  %2667 = vmatprep.subr.bf16.mxu1 %v3137_v5 }
 0x74f   :  { %2637 = vmatpush1.bf16.msra.mxu0 %v3141_v7  ;;  %2669 = vmatpush1.bf16.msra.mxu1 %v3145_v8 }
 0x805   :  { %v1775_v0 = vpop.f32.mrb[16].mxu0  ;;  %v1846_v19 = vpop.f32.mrb[16].mxu1 }
 0x806   :  { %v2126_v22 = vmul.f32 -1.442695, %v1775_v0  ;;  %v1777_v26 = vpop.f32.mrb[17].mxu0  ;;  %v1848_v29 = vpop.f32.mrb[17].mxu1  ;;  %v2128_v36 = vmul.f32 -1.442695, %v1846_v19 }
 0x807   :  { %v2127_v33 = vmul.f32 -1.442695, %v1777_v26 }
 0x808   :  { %2806 = vpow2.f32 %v2126_v22 }
 0x809   :  { %2808 = vpow2.f32 %v2127_v33 }
 0x80a   :  { %2810 = vtanh.f32 %v1848_v29 }
 0x80b   :  { %2812 = vpow2.f32 %v2128_v36 }
 0x812   :  { %v2807_v40 = vpop.eup %2806 }
 0x813   :  { %v1864_v43 = vadd.f32 1.0, %v2807_v40  ;;  %v2809_v47 = vpop.eup %2808 }
 0x814   :  { %v1865_v50 = vadd.f32 1.0, %v2809_v47  ;;  %v2811_v55 = vpop.eup %2810 }
 0x815   :  { %2814 = vrcp.f32 %v1864_v43  ;;  %v2813_v58 = vpop.eup %2812 }
 0x816   :  { %2816 = vrcp.f32 %v1865_v50  ;;  %v1866_v10 = vadd.f32 1.0, %v2813_v58 }
 0x818   :  { %2818 = vrcp.f32 %v1866_v10 }
 0x81f   :  { %v2815_v61 = vpop.eup %2814 }
 0x820   :  { %v1875_v1 = vmul.f32 %v2815_v61, %v2811_v55  ;;  %v2817_v6 = vpop.eup %2816 }
 0x821   :  { %v1874_v14 = vmul.f32 %v2817_v6, %v3385_v15 }
 0x822   :  { %v2819_v24 = vpop.eup %2818 }
 0x823   :  { %v1876_v17 = vadd.f32 %v1875_v1, %v1874_v14 }
 0x825   :  { %2820 = vtanh.f32 %v1876_v17 }
 0x82f   :  { %v2821_v28 = vpop.eup %2820 }
 0x830   :  { %v1878_v34 = vmul.f32 %v2821_v28, %v2819_v24 }
 0x832   :  { %1948 = vmatmul.mubr.f32.vlgmr.msra.gmra.mrb[18].mxu0 %v1878_v34  ;;  %2019 = vmatmul.mubr.f32.vlgmr.msra.gmra.mrb[18].mxu1 %v1878_v34 }
 0x905   :  { %v1949_v38 = vpop.f32.mrb[18].mxu0  ;;  %v2020_v44 = vpop.f32.mrb[18].mxu1 }
 0x906   :  { %v2129_v48 = vmul.f32 -1.442695, %v1949_v38  ;;  %v1951_v54 = vpop.f32.mrb[19].mxu0  ;;  %v2022_v59 = vpop.f32.mrb[19].mxu1  ;;  %v2131_v5 = vmul.f32 -1.442695, %v2020_v44 }
 0x907   :  { %v2130_v2 = vmul.f32 -1.442695, %v1951_v54 }
 0x908   :  { %2822 = vpow2.f32 %v2129_v48 }
 0x909   :  { %2824 = vpow2.f32 %v2130_v2 }
 0x90a   :  { %2826 = vtanh.f32 %v2022_v59 }
 0x90b   :  { %2828 = vpow2.f32 %v2131_v5 }
 0x912   :  { %v2823_v7 = vpop.eup %2822 }
 0x913   :  { %v2038_v8 = vadd.f32 1.0, %v2823_v7  ;;  %v2825_v21 = vpop.eup %2824 }
 0x914   :  { %v2039_v23 = vadd.f32 1.0, %v2825_v21  ;;  %v2827_v25 = vpop.eup %2826 }
 0x915   :  { %2830 = vrcp.f32 %v2038_v8  ;;  %v2829_v27 = vpop.eup %2828 }
 0x916   :  { %2832 = vrcp.f32 %v2039_v23  ;;  %v2040_v35 = vadd.f32 1.0, %v2829_v27 }
 0x918   :  { %2834 = vrcp.f32 %v2040_v35 }
 0x91f   :  { %v2831_v30 = vpop.eup %2830 }
 0x920   :  { %v2049_v31 = vmul.f32 %v2831_v30, %v2827_v25  ;;  %v2833_v32 = vpop.eup %2832 }
 0x921   :  { %v2048_v37 = vmul.f32 %v2833_v32, %v1876_v17 }
 0x922   :  { %v2835_v41 = vpop.eup %2834 }
 0x923   :  { %v2050_v39 = vadd.f32 %v2049_v31, %v2048_v37 }
 0x925   :  { %2836 = vtanh.f32 %v2050_v39 }
 0x92f   :  { %v2837_v42 = vpop.eup %2836 }
 0x930   :  { %v2052_v46 = vmul.f32 %v2837_v42, %v2835_v41 }
 0x932   :  { %v2060_v49 = vmul.f32 %v2132_v45, %v2052_v46 }
 0x934   :  { %2061 = vadd.xlane.f32.xlu0 %v2060_v49 }
 0x9c1   :  { %v2062_v53 = vpop.xlane.xlu0 %2061 }
 0x9c2   :  { %v2065_v56 = vadd.f32 %v2064_v52, %v2062_v53 }
 0x9c4   :  { %v2133_v57 = vmul.f32 -1.442695, %v2065_v56 }
 0x9c6   :  { %2838 = vpow2.f32 %v2133_v57 }
 0x9d0   :  { %v2839_v60 = vpop.eup %2838 }
 0x9d1   :  { %v2069_v62 = vadd.f32 1.0, %v2839_v60 }
 0x9d3   :  { %2840 = vrcp.f32 %v2069_v62 }
 0x9dd   :  { %v2841_v63 = vpop.eup %2840 }
 0x9de   :  { %2073 = vst.msk [vmem:[%s3437_s7] sm:$0xff] %vm2072_vm10, %v2841_v63 }
 0x9df   :  { %2078 = vsyncpa [#allocation5], 1 }
 0x9e0   :  { %2079 = vsyncpa [#allocation7], 1 }

</bundles_post_ra>
